<compile_context>
chip_gen: v5e
topology: v5e:2x2
jax: 0.10.0
libtpu: 0.0.40
codegen_flags: <defaults>
</compile_context>

<pallas_src>
import jax
import jax.numpy as jnp
from jax.experimental import pallas as pl
from jax.experimental.pallas import tpu as pltpu

_MIB = 1024 * 1024


# ----------------------------- helpers --------------------------------------

def _round_up(x, m):
    return ((x + m - 1) // m) * m


def _cdiv(a, b):
    return -(-a // b)


def _resolve_hidden(dim, hidden_dim, multiple_of, ffn_dim_multiplier):
    hidden_dim = int(2 * hidden_dim / 3)
    if ffn_dim_multiplier is not None:
        hidden_dim = int(ffn_dim_multiplier * hidden_dim)
    return multiple_of * ((hidden_dim + multiple_of - 1) // multiple_of)


def _init_linear_weight(key, out_features, in_features, dtype=jnp.float32):
    # Deterministic init mimicking nn.Linear default (uniform in +-1/sqrt(fan_in)).
    bound = 1.0 / (in_features ** 0.5)
    return jax.random.uniform(key, (out_features, in_features), dtype,
                              minval=-bound, maxval=bound)


def _tpu_generation_and_vmem():
    """Best-effort (generation, vmem_capacity_bytes) query with safe fallbacks."""
    vmem = None
    try:
        info = pltpu.get_tpu_info()
        cap = getattr(info, "vmem_capacity_bytes", None)
        if cap:
            vmem = int(cap)
    except Exception:
        pass
    kind = ""
    try:
        kind = jax.devices()[0].device_kind.lower()
    except Exception:
        pass
    if "v5p" in kind:
        gen = "v5p"
    elif "v5" in kind:
        gen = "v5e"
    elif "v6" in kind:
        gen = "v6e"
    elif "7x" in kind or "v7" in kind:
        gen = "v7x"
    else:
        gen = "unknown"
    if vmem is None:
        vmem = {"v5e": 128 * _MIB, "v5p": 128 * _MIB,
                "v6e": 128 * _MIB, "v7x": 64 * _MIB}.get(gen, 64 * _MIB)
    return gen, vmem


def _pick_hidden_tile(hidden, target):
    """Largest multiple of 128 that divides `hidden` and is <= target.
    If hidden is not a multiple of 128 the full hidden dim is used (and the
    caller's VMEM-budget check guards against it blowing up the footprint)."""
    if hidden % 128 != 0:
        return hidden
    target = max(128, min(target, hidden))
    best = 128
    t = 128
    while t <= target:
        if hidden % t == 0:
            best = t
        t += 128
    return best


def select_hidden_tile(hidden, gen=None):
    """Per-generation hidden tile: v5e's MXU is 4x128^2 so K=128/256 is native;
    v6e/v7x MXUs are 2x256^2 so use >=256 (ideally 512) to fill the contraction
    and cut the grid-step count."""
    if gen is None:
        gen, _ = _tpu_generation_and_vmem()
    target = {"v5e": 256, "v5p": 256}.get(gen, 512)
    return _pick_hidden_tile(hidden, target)


def _vmem_footprint(tm, dim, hidden, th, tn, itemsize, cache_gate):
    """Double-buffered I/O tiles + f32 accumulator (+ gate cache if dim-tiled)."""
    buffered = 2 * (tm * dim + dim * 2 * th + th * tn + tm * tn) * itemsize
    acc = tm * tn * 4
    gate = tm * hidden * itemsize if cache_gate else 0
    return buffered + acc + gate


# ------------------------------ kernel --------------------------------------

def _make_ffn_kernel(num_hidden_tiles, hidden_tile, cache_gate):
    th = hidden_tile
    nj = num_hidden_tiles

    def _accumulate(contrib, j, acc_ref, o_ref):
        # Fold init / finalize into the dots: no zero-init store and no extra
        # accumulator store on the last reduction step.
        if nj == 1:
            o_ref[...] = contrib.astype(o_ref.dtype)
            return

        @pl.when(j == 0)
        def _init():
            acc_ref[...] = contrib

        @pl.when(jnp.logical_and(j > 0, j < nj - 1))
        def _accum():
            acc_ref[...] += contrib

        @pl.when(j == nj - 1)
        def _finalize():
            o_ref[...] = (acc_ref[...] + contrib).astype(o_ref.dtype)

    if cache_gate:
        def kernel(x_ref, w13_ref, w2_ref, o_ref, acc_ref, gate_ref):
            d = pl.program_id(1)          # output-column (dim) tile
            j = pl.program_id(2)          # hidden tile (K-reduction)

            @pl.when(d == 0)
            def _gate():
                # Fused gate/up projection, computed once per (token, hidden) tile
                # and cached for the remaining output-column tiles.
                h13 = jnp.dot(x_ref[...], w13_ref[...],
                              preferred_element_type=jnp.float32)
                h1 = h13[:, :th]
                h3 = h13[:, th:]
                gate_ref[j] = ((h1 * jax.nn.sigmoid(h1)) * h3).astype(gate_ref.dtype)

            contrib = jnp.dot(gate_ref[j], w2_ref[...],
                              preferred_element_type=jnp.float32)
            _accumulate(contrib, j, acc_ref, o_ref)
    else:
        def kernel(x_ref, w13_ref, w2_ref, o_ref, acc_ref):
            j = pl.program_id(2)
            h13 = jnp.dot(x_ref[...], w13_ref[...],
                          preferred_element_type=jnp.float32)
            h1 = h13[:, :th]
            h3 = h13[:, th:]
            g = ((h1 * jax.nn.sigmoid(h1)) * h3).astype(w2_ref.dtype)
            contrib = jnp.dot(g, w2_ref[...], preferred_element_type=jnp.float32)
            _accumulate(contrib, j, acc_ref, o_ref)

    return kernel


# ----------------------------- wrappers -------------------------------------

def prepare_ffn_weights(w1, w2, w3, *, hidden_tile, compute_dtype=jnp.bfloat16):
    """One-time weight preparation (hoist out of the per-call hot path):
    transpose to (in, out), cast to the MXU compute dtype and fuse W1/W3 into a
    single tile-interleaved (dim, 2*hidden) matrix matching the kernel split.

    w1: (hidden, dim)  nn.Linear(dim, hidden).weight
    w2: (dim, hidden)  nn.Linear(hidden, dim).weight
    w3: (hidden, dim)  nn.Linear(dim, hidden).weight
    """
    # TODO(synk): optional int8 (v5e/v6e) / fp8 (v7x) weight quantization with
    # per-tile scales to halve weight HBM traffic when the kernel is HBM-bound.
    hidden, dim = w1.shape
    assert hidden % hidden_tile == 0
    nh = hidden // hidden_tile
    w1_t = w1.T.astype(compute_dtype).reshape(dim, nh, hidden_tile)
    w3_t = w3.T.astype(compute_dtype).reshape(dim, nh, hidden_tile)
    # column block j of w13 = [W1^T cols j*th:(j+1)*th | W3^T cols j*th:(j+1)*th]
    w13 = jnp.concatenate([w1_t, w3_t], axis=-1).reshape(dim, 2 * hidden)
    w2_t = w2.T.astype(compute_dtype)                                 # (hidden, dim)
    return w13, w2_t


def feed_forward_pallas(x, w13, w2_t, *, hidden_tile, tm=None, tn=None,
                        compute_dtype=jnp.bfloat16, deep_buffer_w13=False,
                        interpret=False):
    """out = W2( silu(x@W1) * (x@W3) ) with pre-fused / pre-transposed weights.

    tm / tn = None -> auto-selected per TPU generation and VMEM budget.
    """
    orig_shape = x.shape
    dim = orig_shape[-1]
    hidden = w13.shape[1] // 2
    th = hidden_tile
    assert w13.shape == (dim, 2 * hidden)
    assert w2_t.shape == (hidden, dim)
    assert hidden % th == 0
    assert th == hidden or th % 128 == 0, (
        "hidden_tile must be a multiple of 128 (or the full hidden dim)")

    cdt = jnp.dtype(compute_dtype)
    itemsize = cdt.itemsize
    sub = 16 if itemsize == 2 else 8                  # sublane packing alignment

    xf = x.reshape(-1, dim).astype(compute_dtype)     # (N, dim)
    n_tokens = xf.shape[0]

    gen, vmem_cap = _tpu_generation_and_vmem()
    budget = max(8 * _MIB, vmem_cap - 16 * _MIB)      # headroom for Mosaic internals

    # ---- token tile: big enough to be compute-bound on weight re-streaming ----
    if tm is None:
        tm = {"v5e": 256, "v5p": 384, "v6e": 512, "v7x": 640}.get(gen, 512)
    tm_eff = max(sub, min(_round_up(tm, sub), _round_up(n_tokens, sub)))
    if gen == "v7x" and n_tokens > sub:
        # keep >= 2 token tiles so both TensorCores get work
        tm_eff = min(tm_eff, max(sub, _round_up(_cdiv(n_tokens, 2), sub)))

    # ---- output-column (dim) tile: full dim unless VMEM forces tiling ----
    def _tn_candidates():
        yield dim
        if dim % 128 == 0:
            for t in range(dim - 128, 127, -128):
                if dim % t == 0:
                    yield t

    if tn is None:
        chosen = None
        tm_try = tm_eff
        while chosen is None:
            for tn_c in _tn_candidates():
                if _vmem_footprint(tm_try, dim, hidden, th, tn_c, itemsize,
                                   cache_gate=(tn_c != dim)) <= budget:
                    chosen = (tm_try, tn_c)
                    break
            if chosen is None:
                if tm_try <= sub:
                    raise ValueError("FFN tiles do not fit in VMEM; reduce hidden_tile")
                tm_try = max(sub, _round_up(tm_try // 2, sub))
        tm_eff, tn = chosen
    else:
        assert dim % tn == 0
        assert tn == dim or tn % 128 == 0

    n_dim_tiles = dim // tn
    cache_gate = n_dim_tiles > 1
    nj = hidden // th

    est = _vmem_footprint(tm_eff, dim, hidden, th, tn, itemsize, cache_gate)
    assert est <= budget, (
        f"tile footprint {est / _MIB:.1f} MiB exceeds VMEM budget "
        f"{budget / _MIB:.1f} MiB on {gen}; shrink tm / hidden_tile")

    n_pad = _round_up(n_tokens, tm_eff)
    if n_pad != n_tokens:
        xf = jnp.pad(xf, ((0, n_pad - n_tokens), (0, 0)))   # zero rows -> zero outputs

    grid = (n_pad // tm_eff, n_dim_tiles, nj)

    # w13 is only consumed at dim-tile 0; pin its block index for the remaining
    # dim tiles so the pipeline does not re-stream it from HBM.
    if cache_gate:
        w13_map = lambda i, d, j: (0, jnp.where(d == 0, j, nj - 1))
    else:
        w13_map = lambda i, d, j: (0, j)
    w13_kwargs = {}
    if deep_buffer_w13:
        # Optional deeper pipeline for the largest per-step DMA (v6e has the
        # VMEM headroom); keep off on v7x unless the footprint still fits.
        w13_kwargs = dict(pipeline_mode=pl.Buffered(3))

    in_specs = [
        pl.BlockSpec((tm_eff, dim), lambda i, d, j: (i, 0)),     # x (resident over d, j)
        pl.BlockSpec((dim, 2 * th), w13_map, **w13_kwargs),      # fused W1|W3 tile
        pl.BlockSpec((th, tn), lambda i, d, j: (j, d)),          # W2^T tile
    ]
    out_spec = pl.BlockSpec((tm_eff, tn), lambda i, d, j: (i, d))

    scratch = [pltpu.VMEM((tm_eff, tn), jnp.float32)]            # f32 accumulator
    if cache_gate:
        scratch.append(pltpu.VMEM((nj, tm_eff, th), cdt))        # SiLU-gate cache

    # Clamp against the queried chip capacity (never above physical VMEM).
    vmem_limit = int(min(vmem_cap - 8 * _MIB, max(32 * _MIB, est + 8 * _MIB)))

    grid_i = n_pad // tm_eff
    flops = 6 * n_pad * dim * hidden                  # three N x dim x hidden matmuls
    bytes_accessed = (xf.size * itemsize
                      + n_pad * dim * jnp.dtype(x.dtype).itemsize
                      + grid_i * (w13.size + w2_t.size) * itemsize)
    cost = pl.CostEstimate(flops=int(flops), transcendentals=int(n_pad * hidden),
                           bytes_accessed=int(bytes_accessed))

    kernel = _make_ffn_kernel(nj, th, cache_gate)

    out = pl.pallas_call(
        kernel,
        out_shape=jax.ShapeDtypeStruct((n_pad, dim), x.dtype),
        grid_spec=pltpu.PrefetchScalarGridSpec(
            num_scalar_prefetch=0,
            grid=grid,
            in_specs=in_specs,
            out_specs=out_spec,
            scratch_shapes=scratch),
        compiler_params=pltpu.CompilerParams(
            dimension_semantics=("parallel", "arbitrary", "arbitrary"),
            vmem_limit_bytes=vmem_limit),
        cost_estimate=cost,
        interpret=interpret,
    )(xf, w13, w2_t)

    return out[:n_tokens].reshape(orig_shape)


# ---------------------------- reference & demo -------------------------------

def _reference(x, w1, w2, w3, compute_dtype):
    """Pure-JAX reference mirroring the kernel precision (low-precision MXU
    inputs, f32 accumulation, f32 SiLU gate)."""
    xc = x.reshape(-1, x.shape[-1]).astype(compute_dtype)
    h1 = jnp.dot(xc, w1.T.astype(compute_dtype), preferred_element_type=jnp.float32)
    h3 = jnp.dot(xc, w3.T.astype(compute_dtype), preferred_element_type=jnp.float32)
    h = ((h1 * jax.nn.sigmoid(h1)) * h3).astype(compute_dtype)
    out = jnp.dot(h, w2.T.astype(compute_dtype), preferred_element_type=jnp.float32)
    return out.astype(x.dtype).reshape(x.shape)


if __name__ == "__main__":
    # Module hyper-params (small, TPU-tile friendly).
    dim = 256
    hidden_dim_arg = 384
    multiple_of = 128
    ffn_dim_multiplier = None
    hidden = _resolve_hidden(dim, hidden_dim_arg, multiple_of, ffn_dim_multiplier)  # -> 256

    # Deterministic params + input.
    key = jax.random.PRNGKey(0)
    k_w1, k_w2, k_w3, k_x = jax.random.split(key, 4)
    w1 = _init_linear_weight(k_w1, hidden, dim)       # (hidden, dim)
    w2 = _init_linear_weight(k_w2, dim, hidden)       # (dim, hidden)
    w3 = _init_linear_weight(k_w3, hidden, dim)       # (hidden, dim)

    batch, seq = 4, 64                                # 256 tokens
    x = jax.random.normal(k_x, (batch, seq, dim), dtype=jnp.float32)

    # 1) Small explicit tiles exercising every grid axis: 2 token tiles,
    #    2 hidden tiles (K-reduction) and 2 dim tiles (gate-cache path).
    for compute_dtype, tol in ((jnp.float32, 1e-4), (jnp.bfloat16, 2e-2)):
        th = 128
        w13, w2_t = prepare_ffn_weights(w1, w2, w3, hidden_tile=th,
                                        compute_dtype=compute_dtype)
        out = feed_forward_pallas(x, w13, w2_t, hidden_tile=th, tm=128, tn=128,
                                  compute_dtype=compute_dtype)
        out = jax.block_until_ready(out)
        ref = _reference(x, w1, w2, w3, compute_dtype)
        assert out.shape == x.shape
        err = float(jnp.max(jnp.abs(out - ref)))
        assert jnp.allclose(out, ref, atol=tol, rtol=tol), (
            f"mismatch vs reference ({compute_dtype.__name__}, tiled): max abs err {err}")

    # 2) Auto tile selection (per-generation tm / hidden_tile / VMEM budget).
    th = select_hidden_tile(hidden)
    w13, w2_t = prepare_ffn_weights(w1, w2, w3, hidden_tile=th,
                                    compute_dtype=jnp.bfloat16)
    out = feed_forward_pallas(x, w13, w2_t, hidden_tile=th,
                              compute_dtype=jnp.bfloat16)
    out = jax.block_until_ready(out)
    ref = _reference(x, w1, w2, w3, jnp.bfloat16)
    err = float(jnp.max(jnp.abs(out - ref)))
    assert jnp.allclose(out, ref, atol=2e-2, rtol=2e-2), (
        f"mismatch vs reference (auto tiles): max abs err {err}")

    print("KERNEL_OK")
</pallas_src>

<mosaic_0001>
module attributes {stable_mosaic.version = 11 : i64} {
  func.func @kernel(%arg0: i32, %arg1: i32, %arg2: i32, %arg3: memref<128x256xf32, #tpu.memory_space<vmem>>, %arg4: memref<256x256xf32, #tpu.memory_space<vmem>>, %arg5: memref<128x128xf32, #tpu.memory_space<vmem>>, %arg6: memref<128x128xf32, #tpu.memory_space<vmem>>, %arg7: memref<128x128xf32, #tpu.memory_space<vmem>>, %arg8: memref<2x128x128xf32, #tpu.memory_space<vmem>>) attributes {dimension_semantics = [#tpu.dimension_semantics<parallel>, #tpu.dimension_semantics<arbitrary>, #tpu.dimension_semantics<arbitrary>], iteration_bounds = array<i64: 2, 2, 2>, scalar_prefetch = 0 : i64, scratch_operands = 2 : i64, tpu.core_type = #tpu.core_type<tc>, window_params = [{transform_indices = @transform_0, window_bounds = array<i64: 128, 256>}, {transform_indices = @transform_1, window_bounds = array<i64: 256, 256>}, {transform_indices = @transform_2, window_bounds = array<i64: 128, 128>}, {transform_indices = @transform_3, window_bounds = array<i64: 128, 128>}]} {
    %c0_i32 = arith.constant 0 : i32
    %0 = arith.cmpi eq, %arg1, %c0_i32 : i32
    %1 = arith.extui %0 : i1 to i32
    %c0_i32_0 = arith.constant 0 : i32
    %2 = arith.cmpi ne, %1, %c0_i32_0 : i32
    scf.if %2 {
      %c0_10 = arith.constant 0 : index
      %c0_11 = arith.constant 0 : index
      %19 = vector.load %arg3[%c0_10, %c0_11] : memref<128x256xf32, #tpu.memory_space<vmem>>, vector<128x256xf32>
      %c0_12 = arith.constant 0 : index
      %c0_13 = arith.constant 0 : index
      %20 = vector.load %arg4[%c0_12, %c0_13] : memref<256x256xf32, #tpu.memory_space<vmem>>, vector<256x256xf32>
      %cst_14 = arith.constant dense<0.000000e+00> : vector<128x256xf32>
      %21 = tpu.matmul %19, %20, %cst_14 {dimension_numbers = #tpu.dot_dimension_numbers<[1], [0], [0], [1], [0, 0, 1, 1], [], []>} : vector<128x256xf32>, vector<256x256xf32>, vector<128x256xf32> -> vector<128x256xf32>
      %22 = vector.extract_strided_slice %21 {offsets = [0, 0], sizes = [128, 128], strides = [1, 1]} : vector<128x256xf32> to vector<128x128xf32>
      %23 = vector.extract_strided_slice %21 {offsets = [0, 128], sizes = [128, 128], strides = [1, 1]} : vector<128x256xf32> to vector<128x128xf32>
      %24 = arith.negf %22 : vector<128x128xf32>
      %25 = math.exp %24 : vector<128x128xf32>
      %cst_15 = arith.constant 1.000000e+00 : f32
      %26 = vector.broadcast %cst_15 : f32 to vector<128x128xf32>
      %27 = arith.addf %26, %25 : vector<128x128xf32>
      %28 = arith.divf %26, %27 : vector<128x128xf32>
      %29 = arith.mulf %22, %28 : vector<128x128xf32>
      %30 = arith.mulf %29, %23 : vector<128x128xf32>
      %31 = arith.index_cast %arg2 : i32 to index
      %c0_16 = arith.constant 0 : index
      %c0_17 = arith.constant 0 : index
      %32 = vector.load %arg8[%31, %c0_16, %c0_17] : memref<2x128x128xf32, #tpu.memory_space<vmem>>, vector<1x128x128xf32>
      %33 = vector.shape_cast %32 : vector<1x128x128xf32> to vector<128x128xf32>
      %34 = vector.shape_cast %30 : vector<128x128xf32> to vector<1x128x128xf32>
      tpu.vector_store %arg8[%31, %c0_16, %c0_17], %34 {strides = array<i32>} : memref<2x128x128xf32, #tpu.memory_space<vmem>>, vector<1x128x128xf32>,
    } else {
    }
    %3 = arith.index_cast %arg2 : i32 to index
    %c0 = arith.constant 0 : index
    %c0_1 = arith.constant 0 : index
    %4 = vector.load %arg8[%3, %c0, %c0_1] : memref<2x128x128xf32, #tpu.memory_space<vmem>>, vector<1x128x128xf32>
    %5 = vector.shape_cast %4 : vector<1x128x128xf32> to vector<128x128xf32>
    %c0_2 = arith.constant 0 : index
    %c0_3 = arith.constant 0 : index
    %6 = vector.load %arg5[%c0_2, %c0_3] : memref<128x128xf32, #tpu.memory_space<vmem>>, vector<128x128xf32>
    %cst = arith.constant dense<0.000000e+00> : vector<128x128xf32>
    %7 = tpu.matmul %5, %6, %cst {dimension_numbers = #tpu.dot_dimension_numbers<[1], [0], [0], [1], [0, 0, 1, 1], [], []>} : vector<128x128xf32>, vector<128x128xf32>, vector<128x128xf32> -> vector<128x128xf32>
    %c0_i32_4 = arith.constant 0 : i32
    %8 = arith.cmpi eq, %arg2, %c0_i32_4 : i32
    %9 = arith.extui %8 : i1 to i32
    %c0_i32_5 = arith.constant 0 : i32
    %10 = arith.cmpi ne, %9, %c0_i32_5 : i32
    scf.if %10 {
      %c0_10 = arith.constant 0 : index
      %c0_11 = arith.constant 0 : index
      %19 = vector.load %arg7[%c0_10, %c0_11] : memref<128x128xf32, #tpu.memory_space<vmem>>, vector<128x128xf32>
      tpu.vector_store %arg7[%c0_10, %c0_11], %7 {strides = array<i32>} : memref<128x128xf32, #tpu.memory_space<vmem>>, vector<128x128xf32>,
    } else {
    }
    %c0_i32_6 = arith.constant 0 : i32
    %11 = arith.cmpi sgt, %arg2, %c0_i32_6 : i32
    %c1_i32 = arith.constant 1 : i32
    %12 = arith.cmpi slt, %arg2, %c1_i32 : i32
    %13 = arith.andi %11, %12 : i1
    %14 = arith.extui %13 : i1 to i32
    %c0_i32_7 = arith.constant 0 : i32
    %15 = arith.cmpi ne, %14, %c0_i32_7 : i32
    scf.if %15 {
      %c0_10 = arith.constant 0 : index
      %c0_11 = arith.constant 0 : index
      %19 = vector.load %arg7[%c0_10, %c0_11] : memref<128x128xf32, #tpu.memory_space<vmem>>, vector<128x128xf32>
      %20 = arith.addf %19, %7 : vector<128x128xf32>
      %c0_12 = arith.constant 0 : index
      %c0_13 = arith.constant 0 : index
      %21 = vector.load %arg7[%c0_12, %c0_13] : memref<128x128xf32, #tpu.memory_space<vmem>>, vector<128x128xf32>
      tpu.vector_store %arg7[%c0_12, %c0_13], %20 {strides = array<i32>} : memref<128x128xf32, #tpu.memory_space<vmem>>, vector<128x128xf32>,
    } else {
    }
    %c1_i32_8 = arith.constant 1 : i32
    %16 = arith.cmpi eq, %arg2, %c1_i32_8 : i32
    %17 = arith.extui %16 : i1 to i32
    %c0_i32_9 = arith.constant 0 : i32
    %18 = arith.cmpi ne, %17, %c0_i32_9 : i32
    scf.if %18 {
      %c0_10 = arith.constant 0 : index
      %c0_11 = arith.constant 0 : index
      %19 = vector.load %arg7[%c0_10, %c0_11] : memref<128x128xf32, #tpu.memory_space<vmem>>, vector<128x128xf32>
      %20 = arith.addf %19, %7 : vector<128x128xf32>
      %c0_12 = arith.constant 0 : index
      %c0_13 = arith.constant 0 : index
      %21 = vector.load %arg6[%c0_12, %c0_13] : memref<128x128xf32, #tpu.memory_space<vmem>>, vector<128x128xf32>
      tpu.vector_store %arg6[%c0_12, %c0_13], %20 {strides = array<i32>} : memref<128x128xf32, #tpu.memory_space<vmem>>, vector<128x128xf32>,
    } else {
    }
    return
  }
  func.func @transform_0(%arg0: i32, %arg1: i32, %arg2: i32) -> (i32, i32) {
    %c0_i32 = arith.constant 0 : i32
    %c0_i32_0 = arith.constant 0 : i32
    return %arg0, %c0_i32 : i32, i32
  }
  func.func @transform_1(%arg0: i32, %arg1: i32, %arg2: i32) -> (i32, i32) {
    %c0_i32 = arith.constant 0 : i32
    %0 = arith.cmpi eq, %arg1, %c0_i32 : i32
    %c1_i32 = arith.constant 1 : i32
    %1 = arith.select %0, %arg2, %c1_i32 : i32
    %c0_i32_0 = arith.constant 0 : i32
    %c0_i32_1 = arith.constant 0 : i32
    return %c0_i32_0, %1 : i32, i32
  }
  func.func @transform_2(%arg0: i32, %arg1: i32, %arg2: i32) -> (i32, i32) {
    %c0_i32 = arith.constant 0 : i32
    return %arg2, %arg1 : i32, i32
  }
  func.func @transform_3(%arg0: i32, %arg1: i32, %arg2: i32) -> (i32, i32) {
    %c0_i32 = arith.constant 0 : i32
    return %arg0, %arg1 : i32, i32
  }
}

</mosaic_0001>

<bundles_post_ra>
// kernel: tpu_custom_call.1
= control target key start
LH: loop header
LB: loop body
LE: loop exit
PB: predicated region body
PF: predicated region fallthrough
CT: control target
= control target key end

     0   :  { %s2754_s0 = inlined_call_operand.hbm [shape: f32[256,256], index: 0, kind: input, shape index: {}]   ;;  %s2755_s1 = inlined_call_operand.hbm [shape: f32[256,512], index: 1, kind: input, shape index: {}]   ;;  %s2756_s2 = inlined_call_operand.hbm [shape: f32[256,256], index: 2, kind: input, shape index: {}]   ;;  %s2757_s3 = inlined_call_operand.hbm [shape: f32[256,256], index: 3, kind: output, shape index: {}]  }
   0x1   :  { %2776 = sst [smem:[#allocation33_spill]] %s2754_s0 }
   0x2   :  { %2777 = sst [smem:[#allocation34_spill]] %s2755_s1 }
   0x3   :  { %2778 = sst [smem:[#allocation35_spill]] %s2756_s2 }
   0x4   :  { %2779 = sst [smem:[#allocation36_spill]] %s2757_s3 }
   0x5   :  { %8 = vsyncpa [#allocation5], 0 }
   0x6   :  { %10 = vsyncpa [#allocation5 + $0x1], 0 }
   0x7   :  { %11 = vsyncpa [#allocation8], 0 }
   0x8   :  { %13 = vsyncpa [#allocation8 + $0x1], 0 }
   0x9   :  { %14 = vsyncpa [#allocation6], 0 }
   0xa   :  { %16 = vsyncpa [#allocation6 + $0x1], 0  ;;  %s2070_s12 = smov 0   ;;  %s2072_s13 = smov 0  }
   0xb   :  { %s2074_s14 = smov 0   ;;  %s2076_s15 = smov 0  }
   0xc   :  { %s2078_s16 = smov 0   ;;  %s2080_s17 = smov 0  }
   0xd   :  { %s2082_s18 = smov 0   ;;  %s2084_s19 = smov 0  }
   0xe   :  { %s2086_s20 = smov 0   ;;  %s2088_s21 = smov 0  }
   0xf   :  { %s2090_s22 = smov 0   ;;  %s2092_s23 = smov 0  }
  0x10   :  { %s2094_s24 = smov 0   ;;  %s2096_s25 = smov 0  }
  0x11   :  { %s2098_s26 = smov 0   ;;  %s2100_s27 = smov 0  }
  0x12   :  { %s2102_s28 = smov 0   ;;  %s2104_s29 = smov 0  }
  0x13   :  { %s2106_s30 = smov 0  }
  0x14 LB: > { %2780 = sst [smem:[#allocation15_spill]] %s1968_s12  ;;  %s2166_s4 = sadd.s32 4294967295, %s2040_s30   ;;  %s2040_s30 = sphi %s2106_s30, %s22_s30   ;;  %s2036_s29 = sphi %s2104_s29, %s2844_s29   ;;  %s2032_s28 = sphi %s2102_s28, %s2852_s28   ;;  %s2028_s27 = sphi %s2100_s27, %s2851_s27   ;;  %s2024_s26 = sphi %s2098_s26, %s2839_s26   ;;  %s2020_s25 = sphi %s2096_s25, %s2850_s25   ;;  %s2016_s24 = sphi %s2094_s24, %s2849_s24   ;;  %s2012_s23 = sphi %s2092_s23, %s2838_s23   ;;  %s2008_s22 = sphi %s2090_s22, %s2848_s22   ;;  %s2004_s21 = sphi %s2088_s21, %s2847_s21   ;;  %s2000_s20 = sphi %s2086_s20, %s2836_s20   ;;  %s1996_s19 = sphi %s2084_s19, %s2835_s19   ;;  %s1992_s18 = sphi %s2082_s18, %s2834_s18   ;;  %s1988_s17 = sphi %s2080_s17, %s2846_s17   ;;  %s1984_s16 = sphi %s2078_s16, %s2833_s16   ;;  %s1980_s15 = sphi %s2076_s15, %s2832_s15   ;;  %s1976_s14 = sphi %s2074_s14, %s2845_s14   ;;  %s1972_s13 = sphi %s2072_s13, %s2843_s13   ;;  %s1968_s12 = sphi %s2070_s12, %s2841_s12  }
  0x15   : > { %2781 = sst [smem:[#allocation16_spill]] %s1980_s15  ;;  %s34_s5 = sadd.s32 1, %s2028_s27 }
  0x16   : > { %2782 = sst [smem:[#allocation17_spill]] %s1984_s16  ;;  %p35_p0 = scmp.ge.s32.totalorder %s34_s5, 2 }
  0x17   : > { %2783 = sst [smem:[#allocation18_spill]] %s1988_s17  ;;  %s37_s6 = sadd.s32 1, %s2032_s28 }
  0x18   : > { %2784 = sst [smem:[#allocation19_spill]] %s1996_s19  ;;  %p56_p1 = scmp.eq.s32.totalorder %s2040_s30, 0 }
  0x19   : > { %2785 = sst [smem:[#allocation20_spill]] %s2000_s20  ;;  %p2769_p2 = scmp.eq.s32.totalorder %s2166_s4, 0 }
  0x1a   : > { %2786 = sst [smem:[#allocation21_spill]] %s2012_s23  ;;  %s2854_s5 = smov (%p35_p0, %s34_s5), 0 }
  0x1b   : > { %2787 = sst [smem:[#allocation22_spill]] %s2016_s24  ;;  %s2856_s6 = smov (!%p35_p0, %s37_s6), %s2032_s28 }
  0x1c   : > { %2788 = sst [smem:[#allocation23_spill]] %s2020_s25  ;;  %p71_p3 = scmp.eq.s32.totalorder %s2032_s28, 0 }
  0x1d   : > { %2789 = sst [smem:[#allocation24_spill]] %s2024_s26  ;;  %s78_s7 = sadd.s32 1, %s2000_s20 }
  0x1e   : > { %2790 = sst [smem:[#allocation25_spill]] %s2036_s29  ;;  %p39_p4 = scmp.ge.s32.totalorder %s2856_s6, 2 }
  0x1f   : > { %2791 = sst [smem:[#allocation26_spill]] %s2854_s5  ;;  %p85_p5 = scmp.ne.s32.totalorder %s2000_s20, %s1996_s19 }
  0x20   : > { %s72_s8 = scalar_select %p71_p3, %s2028_s27, 1 }
  0x21   : > { %s2186_s9 = scalar_select %p39_p4, 0, %s2856_s6  }
  0x22   : > { %p2190_p6 = por %p85_p5, %p56_p1  ;;  %p91_p7 = scmp.ne.s32.totalorder %s1996_s19, %s1992_s18 }
  0x23   : > { %2792 = sst [smem:[#allocation27_spill]] %s2186_s9  ;;  %p73_p8 = scmp.eq.s32.totalorder %s2186_s9, 0 }
  0x24   : > { %p145_p9 = scmp.eq.s32.totalorder %s2166_s4, 7  ;;  %p2200_p10 = por %p91_p7, %p2769_p2 }
  0x25   : > { %s74_s3 = scalar_select %p73_p8, %s2854_s5, 1 }
  0x26   : > { %s2794_s11 = scalar_select %p2200_p10, 1, 0 }
  0x27   : > { %p1530_p11 = scmp.lt.s32.totalorder %s2040_s30, 8  ;;  %s75_s26 = ssub.s32 %s72_s8, %s74_s3 }
  0x28   : > { %2795 = sst [smem:[#allocation28_spill]] %s2794_s11  ;;  %p76_p12 = scmp.eq.s32.totalorder %s75_s26, 0 }
  0x29   : > { %s194_s24 = sand.u32 1, %s2040_s30   ;;  %s196_s25 = sand.u32 1, %s2000_s20  }
  0x2a   : > { %s2209_s2 = scalar_select %p76_p12, %s2000_s20, %s78_s7  }
  0x2b   : > { %s1416_s18 = sshll.u32 %s196_s25, 9  ;;  %s1457_s19 = sshll.u32 %s72_s8, 4 }
  0x2c   : > { %2796 = sst [smem:[#allocation29_spill]] %s2209_s2  ;;  %s198_s17 = scalar_lea.vmem [#allocation7], %s1416_s18 }
  0x2d   : > { %s2797_s1 = sld [smem:[#allocation34_spill]]  ;;  %s208_s12 = sshll.u32 %s198_s17, 4  ;;  %s209_s12 = int_to_ptr.vmem [resolvable:$true] %s208_s12 }
  0x2e   : > { %p1520_p13 = pnand %p1530_p11, %p2190_p6  ;;  %p1423_p0 = scmp.ge.s32.totalorder %s2040_s30, 1 }
  0x2f   : > { %p240_p3 = scmp.lt.s32.totalorder %s2040_s30, 9  ;;  %s2220_s0 = scalar_lea.sflag [#allocation8], %s194_s24 }
  0x30   : > { %s2042_s3 = smov 512   ;;  %s2766_s15 = smov 256  }
  0x31   : > { %p2225_p5 = pnand %p1423_p0, %p240_p3  ;;  %s41_s25 = sadd.s32 1, %s2036_s29 }
  0x32   : > { %s2858_s25 = smov (!%p39_p4, %s41_s25), %s2036_s29  ;;  %s48_s24 = sadd.s32 1, %s2012_s23 }
  0x33   : > { %s205_s16 = scalar_lea.hbm %s2797_s1, %s1457_s19  ;;  %s1409_s19 = sadd.s32 4294967294, %s2040_s30  }
  0x34   : > { %s206_s11 = sshll.u32 %s205_s16, 4  ;;  %s2768_s16 = smov 16   ;;  %s207_s11 = int_to_ptr.hbm [resolvable:$true] %s206_s11 }
  0x35   : > { %1522 = dma.hbm_to_vmem [thread:$0]  (!%p1520_p13), %s207_s11, 8192, %s209_s12, %s2220_s0, %s2042_s3, %s2766_s15, %s2768_s16  }
  0x36   : > { %p55_p6 = scmp.ne.s32.totalorder %s2012_s23, %s2008_s22  ;;  %p43_p7 = scmp.ge.s32.totalorder %s2858_s25, 2 }
  0x37   : > { %s2799_s26 = sld [smem:[#allocation15_spill]]  ;;  %p61_p8 = scmp.ne.s32.totalorder %s2008_s22, %s2004_s21 }
  0x38   : > { %p2241_p12 = por %p56_p1, %p55_p6  ;;  %s101_s7 = ssub.s32 %s2028_s27, %s2854_s5 }
  0x39   : > { %s2860_s25 = smov (%p43_p7, %s2858_s25), 0  ;;  %p2251_p4 = por %p2769_p2, %p61_p8 }
  0x3a   : > { %2801 = sst [smem:[#allocation30_spill]] %s2860_s25  ;;  %s102_s8 = ssub.s32 %s2032_s28, %s2186_s9 }
  0x3b   : > { %s45_s21 = ssub.s32 %s2036_s29, %s2860_s25  ;;  %s2259_s10 = sor.u32 %s102_s8, %s101_s7 }
  0x3c   : > { %p46_p13 = scmp.eq.s32.totalorder %s45_s21, 0  ;;  %p104_p0 = scmp.eq.s32.totalorder %s2259_s10, 0 }
  0x3d   : > { %s131_s11 = sor.u32 %s102_s8, %s45_s21  ;;  %s134_s18 = sadd.s32 1, %s1976_s14 }
  0x3e   : > { %s2264_s3 = scalar_select %p46_p13, %s2012_s23, %s48_s24  }
  0x3f   : > { %p132_p3 = scmp.eq.s32.totalorder %s131_s11, 0  ;;  %p144_p6 = scmp.ne.s32.totalorder %s1976_s14, %s1972_s13 }
  0x40   : > { %2803 = sst [smem:[#allocation31_spill]] %s2264_s3  ;;  %p150_p7 = scmp.ne.s32.totalorder %s1972_s13, %s2799_s26 }
  0x41   : > { %p151_p8 = scmp.eq.s32.totalorder %s1409_s19, 7  ;;  %s2804_s15 = sld [smem:[#allocation18_spill]] }
  0x42   : > { %s2271_s16 = scalar_select %p132_p3, %s1976_s14, %s134_s18  }
  0x43   : > { %s2806_s1 = sld [smem:[#allocation17_spill]]  ;;  %p2275_p2 = por %p145_p9, %p144_p6 }
  0x44   : > { %2805 = sst [smem:[#allocation32_spill]] %s2271_s16  ;;  %p2279_p13 = por %p151_p8, %p150_p7 }
  0x45   : > { %s171_s8 = sand.u32 1, %s2012_s23   ;;  %s2809_s26 = sld [smem:[#allocation16_spill]] }
  0x46   : > { %s1456_s19 = sshll.u32 %s2036_s29, 8  ;;  %s1412_s21 = sshll.u32 %s171_s8, 8 }
  0x47   : > { %s2810_s25 = sld [smem:[#allocation33_spill]]  ;;  %s175_s3 = scalar_lea.vmem [#allocation4], %s1412_s21 }
  0x48   : > { %s184_s2 = sshll.u32 %s175_s3, 4  ;;  %p1517_p9 = pnand %p1530_p11, %p2241_p12  ;;  %s185_s2 = int_to_ptr.vmem [resolvable:$true] %s184_s2 }
  0x49   : > { %s172_s23 = scalar_lea.sflag [#allocation5], %s171_s8  ;;  %s2811_s20 = smov 16  }
  0x4a   : > { %s2812_s29 = smov 256   ;;  %s106_s16 = sadd.s32 1, %s2804_s15 }
  0x4b   : > { %p113_p3 = scmp.ne.s32.totalorder %s2804_s15, %s2806_s1  ;;  %p119_p7 = scmp.ne.s32.totalorder %s2806_s1, %s2809_s26 }
  0x4c   : > { %s220_s12 = sand.u32 1, %s2804_s15   ;;  %s1458_s3 = sshll.u32 %s2028_s27, 5 }
  0x4d   : > { %s181_s9 = scalar_lea.hbm %s2810_s25, %s1456_s19  ;;  %p2305_p6 = por %p113_p3, %p56_p1 }
  0x4e   : > { %s182_s5 = sshll.u32 %s181_s9, 4  ;;  %p2814_p12 = scmp.eq.s32.totalorder %s2166_s4, 0  ;;  %s183_s5 = int_to_ptr.hbm [resolvable:$true] %s182_s5 }
  0x4f   : > { %1519 = dma.hbm_to_vmem [thread:$0]  (!%p1517_p9), %s183_s5, 4096, %s185_s2, %s172_s23, %s2812_s29, %s2812_s29, %s2811_s20  }
  0x50   : > { %s2301_s25 = scalar_select %p104_p0, %s2804_s15, %s106_s16  }
  0x51   : > { %p2315_p8 = por %p119_p7, %p2814_p12  ;;  %s1419_s2 = sshll.u32 %s220_s12, 7 }
  0x52   : > { %s227_s20 = sadd.s32 %s2032_s28, %s1458_s3  ;;  %s222_s5 = scalar_lea.vmem [#allocation9], %s1419_s2 }
  0x53   : > { %s1422_s23 = sshll.u32 %s227_s20, 3  ;;  %s232_s16 = sshll.u32 %s222_s5, 4  ;;  %s233_s16 = int_to_ptr.vmem [resolvable:$true] %s232_s16 }
  0x54   : > { %s2816_s21 = sld [smem:[#allocation35_spill]]  ;;  %p1523_p1 = pnand %p1530_p11, %p2305_p6 }
  0x55   : > { %s2045_s1 = smov 128   ;;  %s2046_s15 = smov 8  }
  0x56   : > { %s246_s26 = sand.u32 (!%p2225_p5), 1, %s2008_s22  }
  0x57   : > { %s1424_s12 = sshll.u32 (!%p2225_p5), %s246_s26, 8  ;;  %s247_s3 = scalar_lea.sflag (!%p2225_p5), [#allocation5], %s246_s26 }
  0x58   : > { %244 = sbr.rel (%p2225_p5) target bundleno = 736 (0x2e0), region = 32  ;;  %s2332_s2 = scalar_lea.vmem (!%p2225_p5), [#allocation4], %s1424_s12 }
  0x5a   : > { %s229_s11 = scalar_lea.hbm %s2816_s21, %s1422_s23 }
  0x5b   : > { %s230_s18 = sshll.u32 %s229_s11, 4  ;;  %s231_s18 = int_to_ptr.hbm [resolvable:$true] %s230_s18 }
  0x5c   : > { %1525 = dma.hbm_to_vmem [thread:$0]  (!%p1523_p1), %s231_s18, 2048, %s233_s16, %s2220_s0, %s2812_s29, %s2045_s1, %s2046_s15  }
  0x5d   : > { %1951 = dma.done.wait (%p2251_p4), %s247_s3, 4096  }
  0x5e   : > { %1953 = vsyncadd (%p2251_p4), %s247_s3, 4294963200  ;;  %s2817_s9 = sld [smem:[#allocation19_spill]]  ;;  %s256_s23 = sand.u32 1, %s2166_s4  }
  0x5f   : > { %s257_s17 = scalar_lea.sflag [#allocation8], %s256_s23 }
  0x64   : > { %s258_s29 = sand.u32 1, %s2817_s9  }
  0x65   : > { %s1425_s0 = sshll.u32 %s258_s29, 9 }
  0x66   : > { %s2340_s5 = scalar_lea.vmem [#allocation7], %s1425_s0 }
  0x67   : > { %1955 = dma.done.wait (%p2200_p10), %s257_s17, 8192  }
  0x68   : > { %1957 = vsyncadd (%p2200_p10), %s257_s17, 4294959104  ;;  %s2819_s16 = sld [smem:[#allocation17_spill]] }
  0x6e   : > { %s268_s10 = sand.u32 1, %s2819_s16  }
  0x6f   : > { %s1426_s19 = sshll.u32 %s268_s10, 7 }
  0x70   : > { %s2347_s6 = scalar_lea.vmem [#allocation9], %s1426_s19 }
  0x71   : > { %1959 = dma.done.wait (%p2315_p8), %s257_s17, 2048  }
  0x72   : > { %1961 = vsyncadd (%p2315_p8), %s257_s17, 4294965248  ;;  %s301_s4 = sand.u32 1, %s1972_s13   ;;  %s2820_s18 = sld [smem:[#allocation23_spill]] }
  0x73   : > { %s1427_s21 = sshll.u32 %s301_s4, 7 }
  0x74   : > { %s2356_s11 = scalar_lea.vmem [#allocation10], %s1427_s21 }
  0x78   : > { %p1428_p10 = scmp.ne.s32.totalorder %s2820_s18, 0 }
  0x79   : > { %s2821_s8 = sld [smem:[#allocation22_spill]] (!%p1428_p10) }
  0x7a   : > { %313 = sbr.rel (%p1428_p10) target bundleno = 441 (0x1b9), region = 48 }
  0x7f   : > { %v376_v0 = vld [vmem:[%s2340_s5 + $0xf0] sm:$0xff]  ;;  %v374_v2 = vld [vmem:[%s2340_s5 + $0xe0] sm:$0xff]  ;;  %v377_v12 = vld [vmem:[%s2340_s5 + $0xf8] sm:$0xff]  ;;  %s1445_s1 = sshll.u32 %s2821_s8, 7 }
  0x80   : > { %v408_v1 = vld [vmem:[%s2340_s5 + $0x1f0] sm:$0xff]  ;;  %410 = vmatpush.msra.mxu0 %v376_v0  ;;  %v406_v3 = vld [vmem:[%s2340_s5 + $0x1e0] sm:$0xff]  ;;  %v409_v14 = vld [vmem:[%s2340_s5 + $0x1f8] sm:$0xff]  ;;  %540 = vmatpush.msra.mxu2 %v377_v12  ;;  %s2467_s15 = scalar_lea.vmem [#allocation3], %s1445_s1 }
  0x81   : > { %475 = vmatpush.msra.mxu1 %v408_v1  ;;  %v372_v4 = vld [vmem:[%s2340_s5 + $0xd0] sm:$0xff]  ;;  %v370_v6 = vld [vmem:[%s2340_s5 + $0xc0] sm:$0xff]  ;;  %605 = vmatpush.msra.mxu3 %v409_v14  ;;  %v375_v16 = vld [vmem:[%s2340_s5 + $0xe8] sm:$0xff] }
  0x82   : > { %v404_v5 = vld [vmem:[%s2340_s5 + $0x1d0] sm:$0xff]  ;;  %411 = vmatpush.msra.mxu0 %v374_v2  ;;  %v402_v7 = vld [vmem:[%s2340_s5 + $0x1c0] sm:$0xff]  ;;  %v407_v17 = vld [vmem:[%s2340_s5 + $0x1e8] sm:$0xff]  ;;  %541 = vmatpush.msra.mxu2 %v375_v16 }
  0x83   : > { %476 = vmatpush.msra.mxu1 %v406_v3  ;;  %v368_v8 = vld [vmem:[%s2340_s5 + $0xb0] sm:$0xff]  ;;  %v366_v10 = vld [vmem:[%s2340_s5 + $0xa0] sm:$0xff]  ;;  %v373_v18 = vld [vmem:[%s2340_s5 + $0xd8] sm:$0xff]  ;;  %606 = vmatpush.msra.mxu3 %v407_v17 }
  0x84   : > { %412 = vmatpush.msra.mxu0 %v372_v4  ;;  %v400_v9 = vld [vmem:[%s2340_s5 + $0x1b0] sm:$0xff]  ;;  %v398_v11 = vld [vmem:[%s2340_s5 + $0x1a0] sm:$0xff]  ;;  %v405_v19 = vld [vmem:[%s2340_s5 + $0x1d8] sm:$0xff]  ;;  %542 = vmatpush.msra.mxu2 %v373_v18 }
  0x85   : > { %477 = vmatpush.msra.mxu1 %v404_v5  ;;  %v364_v13 = vld [vmem:[%s2340_s5 + $0x90] sm:$0xff]  ;;  %v362_v20 = vld [vmem:[%s2340_s5 + $0x80] sm:$0xff]  ;;  %v371_v22 = vld [vmem:[%s2340_s5 + $0xc8] sm:$0xff]  ;;  %607 = vmatpush.msra.mxu3 %v405_v19 }
  0x86   : > { %413 = vmatpush.msra.mxu0 %v370_v6  ;;  %v396_v15 = vld [vmem:[%s2340_s5 + $0x190] sm:$0xff]  ;;  %v394_v21 = vld [vmem:[%s2340_s5 + $0x180] sm:$0xff]  ;;  %v403_v23 = vld [vmem:[%s2340_s5 + $0x1c8] sm:$0xff]  ;;  %543 = vmatpush.msra.mxu2 %v371_v22 }
  0x87   : > { %478 = vmatpush.msra.mxu1 %v402_v7  ;;  %v360_v24 = vld [vmem:[%s2340_s5 + $0x70] sm:$0xff]  ;;  %v369_v26 = vld [vmem:[%s2340_s5 + $0xb8] sm:$0xff]  ;;  %v358_v28 = vld [vmem:[%s2340_s5 + $0x60] sm:$0xff]  ;;  %608 = vmatpush.msra.mxu3 %v403_v23 }
  0x88   : > { %414 = vmatpush.msra.mxu0 %v368_v8  ;;  %v392_v25 = vld [vmem:[%s2340_s5 + $0x170] sm:$0xff]  ;;  %v401_v27 = vld [vmem:[%s2340_s5 + $0x1b8] sm:$0xff]  ;;  %v390_v29 = vld [vmem:[%s2340_s5 + $0x160] sm:$0xff]  ;;  %544 = vmatpush.msra.mxu2 %v369_v26 }
  0x89   : > { %479 = vmatpush.msra.mxu1 %v400_v9  ;;  %v367_v30 = vld [vmem:[%s2340_s5 + $0xa8] sm:$0xff]  ;;  %v356_v32 = vld [vmem:[%s2340_s5 + $0x50] sm:$0xff]  ;;  %609 = vmatpush.msra.mxu3 %v401_v27  ;;  %v365_v34 = vld [vmem:[%s2340_s5 + $0x98] sm:$0xff] }
  0x8a   : > { %415 = vmatpush.msra.mxu0 %v366_v10  ;;  %v399_v31 = vld [vmem:[%s2340_s5 + $0x1a8] sm:$0xff]  ;;  %v388_v33 = vld [vmem:[%s2340_s5 + $0x150] sm:$0xff]  ;;  %v397_v35 = vld [vmem:[%s2340_s5 + $0x198] sm:$0xff]  ;;  %545 = vmatpush.msra.mxu2 %v367_v30 }
  0x8b   : > { %480 = vmatpush.msra.mxu1 %v398_v11  ;;  %v354_v36 = vld [vmem:[%s2340_s5 + $0x40] sm:$0xff]  ;;  %610 = vmatpush.msra.mxu3 %v399_v31  ;;  %v363_v38 = vld [vmem:[%s2340_s5 + $0x88] sm:$0xff]  ;;  %v352_v40 = vld [vmem:[%s2340_s5 + $0x30] sm:$0xff] }
  0x8c   : > { %416 = vmatpush.msra.mxu0 %v364_v13  ;;  %v386_v37 = vld [vmem:[%s2340_s5 + $0x140] sm:$0xff]  ;;  %v395_v39 = vld [vmem:[%s2340_s5 + $0x188] sm:$0xff]  ;;  %v384_v41 = vld [vmem:[%s2340_s5 + $0x130] sm:$0xff]  ;;  %546 = vmatpush.msra.mxu2 %v365_v34 }
  0x8d   : > { %481 = vmatpush.msra.mxu1 %v396_v15  ;;  %611 = vmatpush.msra.mxu3 %v397_v35  ;;  %v361_v42 = vld [vmem:[%s2340_s5 + $0x78] sm:$0xff]  ;;  %v350_v44 = vld [vmem:[%s2340_s5 + $0x20] sm:$0xff]  ;;  %v359_v46 = vld [vmem:[%s2340_s5 + $0x68] sm:$0xff] }
  0x8e   : > { %417 = vmatpush.msra.mxu0 %v362_v20  ;;  %v393_v43 = vld [vmem:[%s2340_s5 + $0x178] sm:$0xff]  ;;  %v382_v45 = vld [vmem:[%s2340_s5 + $0x120] sm:$0xff]  ;;  %547 = vmatpush.msra.mxu2 %v363_v38  ;;  %v391_v47 = vld [vmem:[%s2340_s5 + $0x168] sm:$0xff] }
  0x8f   : > { %482 = vmatpush.msra.mxu1 %v394_v21  ;;  %612 = vmatpush.msra.mxu3 %v395_v39  ;;  %v348_v48 = vld [vmem:[%s2340_s5 + $0x10] sm:$0xff]  ;;  %v357_v50 = vld [vmem:[%s2340_s5 + $0x58] sm:$0xff]  ;;  %v346_v52 = vld [vmem:[%s2340_s5] sm:$0xff] }
  0x90   : > { %418 = vmatpush.msra.mxu0 %v360_v24  ;;  %v380_v49 = vld [vmem:[%s2340_s5 + $0x110] sm:$0xff]  ;;  %548 = vmatpush.msra.mxu2 %v361_v42  ;;  %v389_v51 = vld [vmem:[%s2340_s5 + $0x158] sm:$0xff]  ;;  %v378_v53 = vld [vmem:[%s2340_s5 + $0x100] sm:$0xff] }
  0x91   : > { %483 = vmatpush.msra.mxu1 %v392_v25  ;;  %613 = vmatpush.msra.mxu3 %v393_v43  ;;  %v314_v54 = vld [vmem:[%s2332_s2] sm:$0xff]  ;;  %v315_v55 = vld [vmem:[%s2332_s2 + $0x8] sm:$0xff]  ;;  %v353_v58 = vld [vmem:[%s2340_s5 + $0x38] sm:$0xff] }
  0x92   : > { %419 = vmatpush.msra.mxu0 %v358_v28  ;;  %549 = vmatpush.msra.mxu2 %v359_v46  ;;  %v355_v56 = vld [vmem:[%s2340_s5 + $0x48] sm:$0xff]  ;;  %v385_v59 = vld [vmem:[%s2340_s5 + $0x138] sm:$0xff]  ;;  %v316_v0 = vld [vmem:[%s2332_s2 + $0x10] sm:$0xff] }
  0x93   : > { %484 = vmatpush.msra.mxu1 %v390_v29  ;;  %614 = vmatpush.msra.mxu3 %v391_v47  ;;  %v387_v57 = vld [vmem:[%s2340_s5 + $0x148] sm:$0xff]  ;;  %v349_v62 = vld [vmem:[%s2340_s5 + $0x18] sm:$0xff]  ;;  %v318_v4 = vld [vmem:[%s2332_s2 + $0x20] sm:$0xff] }
  0x94   : > { %420 = vmatpush.msra.mxu0 %v356_v32  ;;  %550 = vmatpush.msra.mxu2 %v357_v50  ;;  %v351_v60 = vld [vmem:[%s2340_s5 + $0x28] sm:$0xff]  ;;  %v381_v63 = vld [vmem:[%s2340_s5 + $0x118] sm:$0xff]  ;;  %v320_v6 = vld [vmem:[%s2332_s2 + $0x30] sm:$0xff] }
  0x95   : > { %485 = vmatpush.msra.mxu1 %v388_v33  ;;  %615 = vmatpush.msra.mxu3 %v389_v51  ;;  %v383_v61 = vld [vmem:[%s2340_s5 + $0x128] sm:$0xff]  ;;  %v317_v1 = vld [vmem:[%s2332_s2 + $0x18] sm:$0xff]  ;;  %v322_v8 = vld [vmem:[%s2332_s2 + $0x40] sm:$0xff] }
  0x96   : > { %421 = vmatpush.msra.mxu0 %v354_v36  ;;  %551 = vmatpush.msra.mxu2 %v355_v56  ;;  %v347_v2 = vld [vmem:[%s2340_s5 + $0x8] sm:$0xff]  ;;  %v321_v7 = vld [vmem:[%s2332_s2 + $0x38] sm:$0xff]  ;;  %v324_v10 = vld [vmem:[%s2332_s2 + $0x50] sm:$0xff] }
  0x97   : > { %486 = vmatpush.msra.mxu1 %v386_v37  ;;  %616 = vmatpush.msra.mxu3 %v387_v57  ;;  %v379_v3 = vld [vmem:[%s2340_s5 + $0x108] sm:$0xff]  ;;  %v325_v11 = vld [vmem:[%s2332_s2 + $0x58] sm:$0xff]  ;;  %v326_v12 = vld [vmem:[%s2332_s2 + $0x60] sm:$0xff] }
  0x98   : > { %422 = vmatpush.msra.mxu0 %v352_v40  ;;  %552 = vmatpush.msra.mxu2 %v353_v58  ;;  %v319_v5 = vld [vmem:[%s2332_s2 + $0x28] sm:$0xff]  ;;  %v328_v14 = vld [vmem:[%s2332_s2 + $0x70] sm:$0xff]  ;;  %v329_v15 = vld [vmem:[%s2332_s2 + $0x78] sm:$0xff] }
  0x99   : > { %487 = vmatpush.msra.mxu1 %v384_v41  ;;  %617 = vmatpush.msra.mxu3 %v385_v59  ;;  %v323_v9 = vld [vmem:[%s2332_s2 + $0x48] sm:$0xff]  ;;  %v330_v16 = vld [vmem:[%s2332_s2 + $0x80] sm:$0xff]  ;;  %v332_v18 = vld [vmem:[%s2332_s2 + $0x90] sm:$0xff] }
  0x9a   : > { %423 = vmatpush.msra.mxu0 %v350_v44  ;;  %553 = vmatpush.msra.mxu2 %v351_v60  ;;  %v327_v13 = vld [vmem:[%s2332_s2 + $0x68] sm:$0xff]  ;;  %v333_v19 = vld [vmem:[%s2332_s2 + $0x98] sm:$0xff]  ;;  %v334_v20 = vld [vmem:[%s2332_s2 + $0xa0] sm:$0xff] }
  0x9b   : > { %488 = vmatpush.msra.mxu1 %v382_v45  ;;  %618 = vmatpush.msra.mxu3 %v383_v61  ;;  %v331_v17 = vld [vmem:[%s2332_s2 + $0x88] sm:$0xff]  ;;  %v336_v22 = vld [vmem:[%s2332_s2 + $0xb0] sm:$0xff]  ;;  %v337_v23 = vld [vmem:[%s2332_s2 + $0xb8] sm:$0xff] }
  0x9c   : > { %424 = vmatpush.msra.mxu0 %v348_v48  ;;  %554 = vmatpush.msra.mxu2 %v349_v62  ;;  %v335_v21 = vld [vmem:[%s2332_s2 + $0xa8] sm:$0xff]  ;;  %v338_v24 = vld [vmem:[%s2332_s2 + $0xc0] sm:$0xff]  ;;  %v340_v26 = vld [vmem:[%s2332_s2 + $0xd0] sm:$0xff] }
  0x9d   : > { %489 = vmatpush.msra.mxu1 %v380_v49  ;;  %619 = vmatpush.msra.mxu3 %v381_v63  ;;  %v339_v25 = vld [vmem:[%s2332_s2 + $0xc8] sm:$0xff]  ;;  %v341_v27 = vld [vmem:[%s2332_s2 + $0xd8] sm:$0xff]  ;;  %v342_v28 = vld [vmem:[%s2332_s2 + $0xe0] sm:$0xff] }
  0x9e   : > { %425 = vmatpush.msra.mxu0 %v346_v52  ;;  %555 = vmatpush.msra.mxu2 %v347_v2  ;;  %v343_v29 = vld [vmem:[%s2332_s2 + $0xe8] sm:$0xff]  ;;  %v344_v30 = vld [vmem:[%s2332_s2 + $0xf0] sm:$0xff]  ;;  %v345_v31 = vld [vmem:[%s2332_s2 + $0xf8] sm:$0xff] }
  0x9f   : > { %490 = vmatpush.msra.mxu1 %v378_v53  ;;  %426 = vmatmul.f32.vlgmr.msra.gmra.mxu0 %v314_v54 }
  0xa0   : > { %491 = vmatmul.f32.vlgmr.msra.gmra.mxu1 %v315_v55  ;;  %620 = vmatpush.msra.mxu3 %v379_v3 }
  0xa1   : > { %556 = vmatmul.f32.vlgmr.msra.gmra.mxu2 %v314_v54  ;;  %621 = vmatmul.f32.vlgmr.msra.gmra.mxu3 %v315_v55 }
  0xa7   : > { %429 = vmatmul.f32.gmra.mxu0 %v316_v0 }
  0xa8   : > { %494 = vmatmul.f32.gmra.mxu1 %v317_v1 }
  0xa9   : > { %559 = vmatmul.f32.gmra.mxu2 %v316_v0  ;;  %624 = vmatmul.f32.gmra.mxu3 %v317_v1 }
  0xaf   : > { %432 = vmatmul.f32.gmra.mxu0 %v318_v4 }
  0xb0   : > { %497 = vmatmul.f32.gmra.mxu1 %v319_v5 }
  0xb1   : > { %562 = vmatmul.f32.gmra.mxu2 %v318_v4  ;;  %627 = vmatmul.f32.gmra.mxu3 %v319_v5 }
  0xb7   : > { %435 = vmatmul.f32.gmra.mxu0 %v320_v6 }
  0xb8   : > { %500 = vmatmul.f32.gmra.mxu1 %v321_v7 }
  0xb9   : > { %565 = vmatmul.f32.gmra.mxu2 %v320_v6  ;;  %630 = vmatmul.f32.gmra.mxu3 %v321_v7 }
  0xbf   : > { %438 = vmatmul.f32.gmra.mxu0 %v322_v8 }
  0xc0   : > { %503 = vmatmul.f32.gmra.mxu1 %v323_v9 }
  0xc1   : > { %568 = vmatmul.f32.gmra.mxu2 %v322_v8  ;;  %633 = vmatmul.f32.gmra.mxu3 %v323_v9 }
  0xc7   : > { %441 = vmatmul.f32.gmra.mxu0 %v324_v10 }
  0xc8   : > { %506 = vmatmul.f32.gmra.mxu1 %v325_v11 }
  0xc9   : > { %571 = vmatmul.f32.gmra.mxu2 %v324_v10  ;;  %636 = vmatmul.f32.gmra.mxu3 %v325_v11 }
  0xcf   : > { %444 = vmatmul.f32.gmra.mxu0 %v326_v12 }
  0xd0   : > { %509 = vmatmul.f32.gmra.mxu1 %v327_v13 }
  0xd1   : > { %574 = vmatmul.f32.gmra.mxu2 %v326_v12  ;;  %639 = vmatmul.f32.gmra.mxu3 %v327_v13 }
  0xd7   : > { %447 = vmatmul.f32.gmra.mxu0 %v328_v14 }
  0xd8   : > { %512 = vmatmul.f32.gmra.mxu1 %v329_v15 }
  0xd9   : > { %577 = vmatmul.f32.gmra.mxu2 %v328_v14  ;;  %642 = vmatmul.f32.gmra.mxu3 %v329_v15 }
  0xdf   : > { %450 = vmatmul.f32.gmra.mxu0 %v330_v16 }
  0xe0   : > { %515 = vmatmul.f32.gmra.mxu1 %v331_v17 }
  0xe1   : > { %580 = vmatmul.f32.gmra.mxu2 %v330_v16  ;;  %645 = vmatmul.f32.gmra.mxu3 %v331_v17 }
  0xe7   : > { %453 = vmatmul.f32.gmra.mxu0 %v332_v18 }
  0xe8   : > { %518 = vmatmul.f32.gmra.mxu1 %v333_v19 }
  0xe9   : > { %583 = vmatmul.f32.gmra.mxu2 %v332_v18  ;;  %648 = vmatmul.f32.gmra.mxu3 %v333_v19 }
  0xef   : > { %456 = vmatmul.f32.gmra.mxu0 %v334_v20 }
  0xf0   : > { %521 = vmatmul.f32.gmra.mxu1 %v335_v21 }
  0xf1   : > { %586 = vmatmul.f32.gmra.mxu2 %v334_v20  ;;  %651 = vmatmul.f32.gmra.mxu3 %v335_v21 }
  0xf7   : > { %459 = vmatmul.f32.gmra.mxu0 %v336_v22 }
  0xf8   : > { %524 = vmatmul.f32.gmra.mxu1 %v337_v23 }
  0xf9   : > { %589 = vmatmul.f32.gmra.mxu2 %v336_v22  ;;  %654 = vmatmul.f32.gmra.mxu3 %v337_v23 }
  0xff   : > { %462 = vmatmul.f32.gmra.mxu0 %v338_v24 }
 0x100   : > { %527 = vmatmul.f32.gmra.mxu1 %v339_v25 }
 0x101   : > { %592 = vmatmul.f32.gmra.mxu2 %v338_v24  ;;  %657 = vmatmul.f32.gmra.mxu3 %v339_v25 }
 0x107   : > { %465 = vmatmul.f32.gmra.mxu0 %v340_v26 }
 0x108   : > { %530 = vmatmul.f32.gmra.mxu1 %v341_v27 }
 0x109   : > { %595 = vmatmul.f32.gmra.mxu2 %v340_v26  ;;  %660 = vmatmul.f32.gmra.mxu3 %v341_v27 }
 0x10f   : > { %468 = vmatmul.f32.gmra.mxu0 %v342_v28 }
 0x110   : > { %533 = vmatmul.f32.gmra.mxu1 %v343_v29 }
 0x111   : > { %598 = vmatmul.f32.gmra.mxu2 %v342_v28  ;;  %663 = vmatmul.f32.gmra.mxu3 %v343_v29 }
 0x117   : > { %471 = vmatmul.f32.gmra.mxu0 %v344_v30 }
 0x118   : > { %536 = vmatmul.f32.gmra.mxu1 %v345_v31 }
 0x119   : > { %601 = vmatmul.f32.gmra.mxu2 %v344_v30  ;;  %666 = vmatmul.f32.gmra.mxu3 %v345_v31 }
 0x11c   : > { %v427_v32 = vpop.f32.mrf.mxu0 }
 0x11d   : > { %v492_v33 = vpop.f32.mrf.mxu1 }
 0x11e   : > { %v493_v34 = vadd.f32 %v492_v33, %v427_v32 }
 0x120   : > { %v1429_v35 = vmul.f32 -1.442695, %v493_v34 }
 0x122   : > { %1692 = vpow2.f32 %v1429_v35 }
 0x124   : > { %v430_v36 = vpop.f32.mrf.mxu0  ;;  %v557_v45 = vpop.f32.mrf.mxu2 }
 0x125   : > { %v495_v37 = vpop.f32.mrf.mxu1  ;;  %v622_v46 = vpop.f32.mrf.mxu3 }
 0x126   : > { %v2455_v38 = vadd.f32 %v495_v37, %v430_v36  ;;  %v623_v5 = vadd.f32 %v622_v46, %v557_v45 }
 0x128   : > { %v1693_v39 = vpop.eup %1692  ;;  %v1430_v40 = vmul.f32 -1.442695, %v2455_v38 }
 0x129   : > { %v718_v41 = vadd.f32 1.0, %v1693_v39 }
 0x12a   : > { %1694 = vpow2.f32 %v1430_v40 }
 0x12b   : > { %1696 = vrcp.f32 %v718_v41  ;;  %v743_v53 = vand.u32 2147483647, %v718_v41  ;;  %v745_v54 = vand.u32 2147483648, %v718_v41  ;;  %vm739_vm1 = vweird.f32 %v718_v41 }
 0x12c   : > { %v433_v42 = vpop.f32.mrf.mxu0  ;;  %v560_v59 = vpop.f32.mrf.mxu2 }
 0x12d   : > { %v498_v43 = vpop.f32.mrf.mxu1  ;;  %v625_v60 = vpop.f32.mrf.mxu3  ;;  %vm744_vm3 = vcmp.eq.f32.partialorder %v743_v53, 8.507059e+37  ;;  %v746_v1 = vor.u32 1.1754944e-38, %v745_v54 }
 0x12e   : > { %v2458_v44 = vadd.f32 %v498_v43, %v433_v42  ;;  %v626_v26 = vadd.f32 %v625_v60, %v560_v59 }
 0x130   : > { %v1695_v47 = vpop.eup %1694  ;;  %v1431_v48 = vmul.f32 -1.442695, %v2458_v44 }
 0x131   : > { %v1697_v49 = vpop.eup %1696  ;;  %v719_v50 = vadd.f32 1.0, %v1695_v47 }
 0x132   : > { %v735_v51 = vmul.f32 %v1697_v49, %v718_v41  ;;  %1698 = vpow2.f32 %v1431_v48  ;;  %vm740_vm0 = vweird.f32 %v1697_v49 }
 0x133   : > { %1700 = vrcp.f32 %v719_v50  ;;  %vm741_vm2 = vmor %vm739_vm1, %vm740_vm0  ;;  %v758_v9 = vand.u32 2147483647, %v719_v50  ;;  %v760_v10 = vand.u32 2147483648, %v719_v50  ;;  %vm754_vm5 = vweird.f32 %v719_v50 }
 0x134   : > { %v736_v52 = vsub.f32 1.0, %v735_v51  ;;  %v436_v55 = vpop.f32.mrf.mxu0  ;;  %v563_v16 = vpop.f32.mrf.mxu2 }
 0x135   : > { %v501_v56 = vpop.f32.mrf.mxu1  ;;  %v628_v17 = vpop.f32.mrf.mxu3  ;;  %vm759_vm7 = vcmp.eq.f32.partialorder %v758_v9, 8.507059e+37  ;;  %v761_v22 = vor.u32 1.1754944e-38, %v760_v10 }
 0x136   : > { %v737_v57 = vmul.f32 %v1697_v49, %v736_v52  ;;  %v2461_v58 = vadd.f32 %v501_v56, %v436_v55  ;;  %v629_v48 = vadd.f32 %v628_v17, %v563_v16 }
 0x138   : > { %v1699_v61 = vpop.eup %1698  ;;  %v738_v62 = vadd.f32 %v1697_v49, %v737_v57  ;;  %v1432_v63 = vmul.f32 -1.442695, %v2461_v58 }
 0x139   : > { %v1701_v0 = vpop.eup %1700  ;;  %v720_v2 = vadd.f32 1.0, %v1699_v61 }
 0x13a   : > { %v742_v3 = vsel %vm741_vm2, %v1697_v49, %v738_v62  ;;  %v750_v4 = vmul.f32 %v1701_v0, %v719_v50  ;;  %1702 = vpow2.f32 %v1432_v63  ;;  %vm755_vm4 = vweird.f32 %v1701_v0 }
 0x13b   : > { %v747_v6 = vsel %vm744_vm3, %v746_v1, %v742_v3  ;;  %1704 = vrcp.f32 %v720_v2  ;;  %vm756_vm6 = vmor %vm754_vm5, %vm755_vm4  ;;  %v773_v30 = vand.u32 2147483647, %v720_v2  ;;  %v775_v31 = vand.u32 2147483648, %v720_v2 }
 0x13c   : > { %v974_v7 = vmul.f32 %v747_v6, %v493_v34  ;;  %v751_v8 = vsub.f32 1.0, %v750_v4  ;;  %v439_v11 = vpop.f32.mrf.mxu0  ;;  %v566_v37 = vpop.f32.mrf.mxu2  ;;  %vm769_vm9 = vweird.f32 %v720_v2 }
 0x13d   : > { %v504_v12 = vpop.f32.mrf.mxu1  ;;  %v631_v39 = vpop.f32.mrf.mxu3  ;;  %vm774_vm11 = vcmp.eq.f32.partialorder %v773_v30, 8.507059e+37 }
 0x13e   : > { %v752_v13 = vmul.f32 %v1701_v0, %v751_v8  ;;  %v990_v14 = vmul.f32 %v974_v7, %v623_v5  ;;  %v2465_v15 = vadd.f32 %v504_v12, %v439_v11  ;;  %v632_v5 = vadd.f32 %v631_v39, %v566_v37 }
 0x140   : > { %v1703_v18 = vpop.eup %1702  ;;  %v753_v19 = vadd.f32 %v1701_v0, %v752_v13  ;;  %1008 = vst [vmem:[%s2467_s15] sm:$0xff] %v990_v14  ;;  %v1433_v20 = vmul.f32 -1.442695, %v2465_v15 }
 0x141   : > { %v1705_v21 = vpop.eup %1704  ;;  %v721_v23 = vadd.f32 1.0, %v1703_v18 }
 0x142   : > { %v757_v24 = vsel %vm756_vm6, %v1701_v0, %v753_v19  ;;  %v765_v25 = vmul.f32 %v1705_v21, %v720_v2  ;;  %1706 = vpow2.f32 %v1433_v20  ;;  %vm770_vm8 = vweird.f32 %v1705_v21 }
 0x143   : > { %v762_v27 = vsel %vm759_vm7, %v761_v22, %v757_v24  ;;  %1708 = vrcp.f32 %v721_v23  ;;  %vm771_vm10 = vmor %vm769_vm9, %vm770_vm8  ;;  %v788_v52 = vand.u32 2147483647, %v721_v23  ;;  %v790_v53 = vand.u32 2147483648, %v721_v23 }
 0x144   : > { %v975_v28 = vmul.f32 %v762_v27, %v2455_v38  ;;  %v766_v29 = vsub.f32 1.0, %v765_v25  ;;  %v442_v32 = vpop.f32.mrf.mxu0  ;;  %v776_v38 = vor.u32 1.1754944e-38, %v775_v31  ;;  %v569_v60 = vpop.f32.mrf.mxu2  ;;  %vm784_vm13 = vweird.f32 %v721_v23 }
 0x145   : > { %v507_v33 = vpop.f32.mrf.mxu1  ;;  %v634_v61 = vpop.f32.mrf.mxu3  ;;  %vm789_vm15 = vcmp.eq.f32.partialorder %v788_v52, 8.507059e+37 }
 0x146   : > { %v767_v34 = vmul.f32 %v1705_v21, %v766_v29  ;;  %v991_v35 = vmul.f32 %v975_v28, %v626_v26  ;;  %v2472_v36 = vadd.f32 %v507_v33, %v442_v32  ;;  %v635_v26 = vadd.f32 %v634_v61, %v569_v60 }
 0x148   : > { %v1707_v40 = vpop.eup %1706  ;;  %v768_v41 = vadd.f32 %v1705_v21, %v767_v34  ;;  %1009 = vst [vmem:[%s2467_s15 + $0x8] sm:$0xff] %v991_v35  ;;  %v1434_v42 = vmul.f32 -1.442695, %v2472_v36 }
 0x149   : > { %v1709_v43 = vpop.eup %1708  ;;  %v722_v45 = vadd.f32 1.0, %v1707_v40 }
 0x14a   : > { %v772_v46 = vsel %vm771_vm10, %v1705_v21, %v768_v41  ;;  %v780_v47 = vmul.f32 %v1709_v43, %v721_v23  ;;  %1710 = vpow2.f32 %v1434_v42  ;;  %vm785_vm12 = vweird.f32 %v1709_v43 }
 0x14b   : > { %v777_v49 = vsel %vm774_vm11, %v776_v38, %v772_v46  ;;  %1712 = vrcp.f32 %v722_v45  ;;  %vm786_vm14 = vmor %vm784_vm13, %vm785_vm12  ;;  %v803_v9 = vand.u32 2147483647, %v722_v45  ;;  %v805_v10 = vand.u32 2147483648, %v722_v45 }
 0x14c   : > { %v976_v50 = vmul.f32 %v777_v49, %v2458_v44  ;;  %v781_v51 = vsub.f32 1.0, %v780_v47  ;;  %v445_v54 = vpop.f32.mrf.mxu0  ;;  %v791_v44 = vor.u32 1.1754944e-38, %v790_v53  ;;  %v572_v17 = vpop.f32.mrf.mxu2  ;;  %vm799_vm1 = vweird.f32 %v722_v45 }
 0x14d   : > { %v510_v55 = vpop.f32.mrf.mxu1  ;;  %v637_v18 = vpop.f32.mrf.mxu3  ;;  %vm804_vm3 = vcmp.eq.f32.partialorder %v803_v9, 8.507059e+37 }
 0x14e   : > { %v782_v56 = vmul.f32 %v1709_v43, %v781_v51  ;;  %v992_v57 = vmul.f32 %v976_v50, %v629_v48  ;;  %v2477_v59 = vadd.f32 %v510_v55, %v445_v54  ;;  %v638_v48 = vadd.f32 %v637_v18, %v572_v17 }
 0x150   : > { %v1711_v62 = vpop.eup %1710  ;;  %v783_v63 = vadd.f32 %v1709_v43, %v782_v56  ;;  %1010 = vst [vmem:[%s2467_s15 + $0x10] sm:$0xff] %v992_v57  ;;  %v1435_v0 = vmul.f32 -1.442695, %v2477_v59 }
 0x151   : > { %v1713_v1 = vpop.eup %1712  ;;  %v723_v2 = vadd.f32 1.0, %v1711_v62 }
 0x152   : > { %v787_v3 = vsel %vm786_vm14, %v1709_v43, %v783_v63  ;;  %v795_v4 = vmul.f32 %v1713_v1, %v722_v45  ;;  %1714 = vpow2.f32 %v1435_v0  ;;  %vm800_vm0 = vweird.f32 %v1713_v1 }
 0x153   : > { %v792_v6 = vsel %vm789_vm15, %v791_v44, %v787_v3  ;;  %1716 = vrcp.f32 %v723_v2  ;;  %vm801_vm2 = vmor %vm799_vm1, %vm800_vm0  ;;  %v818_v30 = vand.u32 2147483647, %v723_v2  ;;  %v820_v31 = vand.u32 2147483648, %v723_v2 }
 0x154   : > { %v977_v7 = vmul.f32 %v792_v6, %v2461_v58  ;;  %v796_v8 = vsub.f32 1.0, %v795_v4  ;;  %v448_v11 = vpop.f32.mrf.mxu0  ;;  %v806_v58 = vor.u32 1.1754944e-38, %v805_v10  ;;  %v575_v39 = vpop.f32.mrf.mxu2  ;;  %vm814_vm5 = vweird.f32 %v723_v2 }
 0x155   : > { %v513_v12 = vpop.f32.mrf.mxu1  ;;  %v640_v40 = vpop.f32.mrf.mxu3  ;;  %vm819_vm7 = vcmp.eq.f32.partialorder %v818_v30, 8.507059e+37 }
 0x156   : > { %v797_v13 = vmul.f32 %v1713_v1, %v796_v8  ;;  %v993_v14 = vmul.f32 %v977_v7, %v632_v5  ;;  %v2482_v16 = vadd.f32 %v513_v12, %v448_v11  ;;  %v641_v5 = vadd.f32 %v640_v40, %v575_v39 }
 0x158   : > { %v1715_v19 = vpop.eup %1714  ;;  %v798_v20 = vadd.f32 %v1713_v1, %v797_v13  ;;  %1011 = vst [vmem:[%s2467_s15 + $0x18] sm:$0xff] %v993_v14  ;;  %v1436_v21 = vmul.f32 -1.442695, %v2482_v16 }
 0x159   : > { %v1717_v22 = vpop.eup %1716  ;;  %v724_v23 = vadd.f32 1.0, %v1715_v19 }
 0x15a   : > { %v802_v24 = vsel %vm801_vm2, %v1713_v1, %v798_v20  ;;  %v810_v25 = vmul.f32 %v1717_v22, %v723_v2  ;;  %1718 = vpow2.f32 %v1436_v21  ;;  %vm815_vm4 = vweird.f32 %v1717_v22 }
 0x15b   : > { %v807_v27 = vsel %vm804_vm3, %v806_v58, %v802_v24  ;;  %1720 = vrcp.f32 %v724_v23  ;;  %vm816_vm6 = vmor %vm814_vm5, %vm815_vm4  ;;  %v833_v52 = vand.u32 2147483647, %v724_v23  ;;  %v835_v53 = vand.u32 2147483648, %v724_v23 }
 0x15c   : > { %v978_v28 = vmul.f32 %v807_v27, %v2465_v15  ;;  %v811_v29 = vsub.f32 1.0, %v810_v25  ;;  %v451_v32 = vpop.f32.mrf.mxu0  ;;  %v821_v15 = vor.u32 1.1754944e-38, %v820_v31  ;;  %v578_v61 = vpop.f32.mrf.mxu2  ;;  %vm829_vm9 = vweird.f32 %v724_v23 }
 0x15d   : > { %v516_v33 = vpop.f32.mrf.mxu1  ;;  %v643_v62 = vpop.f32.mrf.mxu3  ;;  %vm834_vm11 = vcmp.eq.f32.partialorder %v833_v52, 8.507059e+37 }
 0x15e   : > { %v812_v34 = vmul.f32 %v1717_v22, %v811_v29  ;;  %v994_v35 = vmul.f32 %v978_v28, %v635_v26  ;;  %v2487_v37 = vadd.f32 %v516_v33, %v451_v32  ;;  %v644_v26 = vadd.f32 %v643_v62, %v578_v61 }
 0x160   : > { %v1719_v41 = vpop.eup %1718  ;;  %v813_v42 = vadd.f32 %v1717_v22, %v812_v34  ;;  %1012 = vst [vmem:[%s2467_s15 + $0x20] sm:$0xff] %v994_v35  ;;  %v1437_v43 = vmul.f32 -1.442695, %v2487_v37 }
 0x161   : > { %v1721_v38 = vpop.eup %1720  ;;  %v725_v45 = vadd.f32 1.0, %v1719_v41 }
 0x162   : > { %v817_v46 = vsel %vm816_vm6, %v1717_v22, %v813_v42  ;;  %v825_v47 = vmul.f32 %v1721_v38, %v724_v23  ;;  %1722 = vpow2.f32 %v1437_v43  ;;  %vm830_vm8 = vweird.f32 %v1721_v38 }
 0x163   : > { %v822_v49 = vsel %vm819_vm7, %v821_v15, %v817_v46  ;;  %1724 = vrcp.f32 %v725_v45  ;;  %vm831_vm10 = vmor %vm829_vm9, %vm830_vm8  ;;  %v848_v9 = vand.u32 2147483647, %v725_v45  ;;  %v850_v10 = vand.u32 2147483648, %v725_v45 }
 0x164   : > { %v979_v50 = vmul.f32 %v822_v49, %v2472_v36  ;;  %v826_v51 = vsub.f32 1.0, %v825_v47  ;;  %v454_v54 = vpop.f32.mrf.mxu0  ;;  %v836_v36 = vor.u32 1.1754944e-38, %v835_v53  ;;  %v581_v18 = vpop.f32.mrf.mxu2  ;;  %vm844_vm13 = vweird.f32 %v725_v45 }
 0x165   : > { %v519_v55 = vpop.f32.mrf.mxu1  ;;  %v646_v19 = vpop.f32.mrf.mxu3  ;;  %vm849_vm15 = vcmp.eq.f32.partialorder %v848_v9, 8.507059e+37 }
 0x166   : > { %v827_v56 = vmul.f32 %v1721_v38, %v826_v51  ;;  %v995_v57 = vmul.f32 %v979_v50, %v638_v48  ;;  %v2492_v60 = vadd.f32 %v519_v55, %v454_v54  ;;  %v647_v48 = vadd.f32 %v646_v19, %v581_v18 }
 0x168   : > { %v1723_v63 = vpop.eup %1722  ;;  %v828_v0 = vadd.f32 %v1721_v38, %v827_v56  ;;  %1013 = vst [vmem:[%s2467_s15 + $0x28] sm:$0xff] %v995_v57  ;;  %v1438_v1 = vmul.f32 -1.442695, %v2492_v60 }
 0x169   : > { %v1725_v44 = vpop.eup %1724  ;;  %v726_v2 = vadd.f32 1.0, %v1723_v63 }
 0x16a   : > { %v832_v3 = vsel %vm831_vm10, %v1721_v38, %v828_v0  ;;  %v840_v4 = vmul.f32 %v1725_v44, %v725_v45  ;;  %1726 = vpow2.f32 %v1438_v1  ;;  %vm845_vm12 = vweird.f32 %v1725_v44 }
 0x16b   : > { %v837_v6 = vsel %vm834_vm11, %v836_v36, %v832_v3  ;;  %1728 = vrcp.f32 %v726_v2  ;;  %vm846_vm14 = vmor %vm844_vm13, %vm845_vm12  ;;  %v863_v30 = vand.u32 2147483647, %v726_v2  ;;  %v865_v31 = vand.u32 2147483648, %v726_v2 }
 0x16c   : > { %v980_v7 = vmul.f32 %v837_v6, %v2477_v59  ;;  %v841_v8 = vsub.f32 1.0, %v840_v4  ;;  %v457_v11 = vpop.f32.mrf.mxu0  ;;  %v851_v59 = vor.u32 1.1754944e-38, %v850_v10  ;;  %v584_v40 = vpop.f32.mrf.mxu2  ;;  %vm859_vm1 = vweird.f32 %v726_v2 }
 0x16d   : > { %v522_v12 = vpop.f32.mrf.mxu1  ;;  %v649_v41 = vpop.f32.mrf.mxu3  ;;  %vm864_vm3 = vcmp.eq.f32.partialorder %v863_v30, 8.507059e+37 }
 0x16e   : > { %v842_v13 = vmul.f32 %v1725_v44, %v841_v8  ;;  %v996_v14 = vmul.f32 %v980_v7, %v641_v5  ;;  %v2497_v17 = vadd.f32 %v522_v12, %v457_v11  ;;  %v650_v5 = vadd.f32 %v649_v41, %v584_v40 }
 0x170   : > { %v1727_v20 = vpop.eup %1726  ;;  %v843_v21 = vadd.f32 %v1725_v44, %v842_v13  ;;  %1014 = vst [vmem:[%s2467_s15 + $0x30] sm:$0xff] %v996_v14  ;;  %v1439_v22 = vmul.f32 -1.442695, %v2497_v17 }
 0x171   : > { %v1729_v58 = vpop.eup %1728  ;;  %v727_v23 = vadd.f32 1.0, %v1727_v20 }
 0x172   : > { %v847_v24 = vsel %vm846_vm14, %v1725_v44, %v843_v21  ;;  %v855_v25 = vmul.f32 %v1729_v58, %v726_v2  ;;  %1730 = vpow2.f32 %v1439_v22  ;;  %vm860_vm0 = vweird.f32 %v1729_v58 }
 0x173   : > { %v852_v27 = vsel %vm849_vm15, %v851_v59, %v847_v24  ;;  %1732 = vrcp.f32 %v727_v23  ;;  %vm861_vm2 = vmor %vm859_vm1, %vm860_vm0  ;;  %v878_v52 = vand.u32 2147483647, %v727_v23  ;;  %v880_v53 = vand.u32 2147483648, %v727_v23 }
 0x174   : > { %v981_v28 = vmul.f32 %v852_v27, %v2482_v16  ;;  %v856_v29 = vsub.f32 1.0, %v855_v25  ;;  %v460_v32 = vpop.f32.mrf.mxu0  ;;  %v866_v16 = vor.u32 1.1754944e-38, %v865_v31  ;;  %v587_v62 = vpop.f32.mrf.mxu2  ;;  %vm874_vm5 = vweird.f32 %v727_v23 }
 0x175   : > { %v525_v33 = vpop.f32.mrf.mxu1  ;;  %v652_v63 = vpop.f32.mrf.mxu3  ;;  %vm879_vm7 = vcmp.eq.f32.partialorder %v878_v52, 8.507059e+37 }
 0x176   : > { %v857_v34 = vmul.f32 %v1729_v58, %v856_v29  ;;  %v997_v35 = vmul.f32 %v981_v28, %v644_v26  ;;  %v2502_v39 = vadd.f32 %v525_v33, %v460_v32  ;;  %v653_v26 = vadd.f32 %v652_v63, %v587_v62 }
 0x178   : > { %v1731_v42 = vpop.eup %1730  ;;  %v858_v43 = vadd.f32 %v1729_v58, %v857_v34  ;;  %1015 = vst [vmem:[%s2467_s15 + $0x38] sm:$0xff] %v997_v35  ;;  %v1440_v38 = vmul.f32 -1.442695, %v2502_v39 }
 0x179   : > { %v1733_v15 = vpop.eup %1732  ;;  %v728_v45 = vadd.f32 1.0, %v1731_v42 }
 0x17a   : > { %v862_v46 = vsel %vm861_vm2, %v1729_v58, %v858_v43  ;;  %v870_v47 = vmul.f32 %v1733_v15, %v727_v23  ;;  %1734 = vpow2.f32 %v1440_v38  ;;  %vm875_vm4 = vweird.f32 %v1733_v15 }
 0x17b   : > { %v867_v49 = vsel %vm864_vm3, %v866_v16, %v862_v46  ;;  %1736 = vrcp.f32 %v728_v45  ;;  %vm876_vm6 = vmor %vm874_vm5, %vm875_vm4  ;;  %v893_v9 = vand.u32 2147483647, %v728_v45  ;;  %v895_v10 = vand.u32 2147483648, %v728_v45 }
 0x17c   : > { %v982_v50 = vmul.f32 %v867_v49, %v2487_v37  ;;  %v871_v51 = vsub.f32 1.0, %v870_v47  ;;  %v463_v54 = vpop.f32.mrf.mxu0  ;;  %v881_v37 = vor.u32 1.1754944e-38, %v880_v53  ;;  %v590_v19 = vpop.f32.mrf.mxu2  ;;  %vm889_vm9 = vweird.f32 %v728_v45 }
 0x17d   : > { %v528_v55 = vpop.f32.mrf.mxu1  ;;  %v655_v20 = vpop.f32.mrf.mxu3  ;;  %vm894_vm11 = vcmp.eq.f32.partialorder %v893_v9, 8.507059e+37 }
 0x17e   : > { %v872_v56 = vmul.f32 %v1733_v15, %v871_v51  ;;  %v998_v57 = vmul.f32 %v982_v50, %v647_v48  ;;  %v2507_v61 = vadd.f32 %v528_v55, %v463_v54  ;;  %v656_v48 = vadd.f32 %v655_v20, %v590_v19 }
 0x180   : > { %v1735_v0 = vpop.eup %1734  ;;  %v873_v1 = vadd.f32 %v1733_v15, %v872_v56  ;;  %1016 = vst [vmem:[%s2467_s15 + $0x40] sm:$0xff] %v998_v57  ;;  %v1441_v44 = vmul.f32 -1.442695, %v2507_v61 }
 0x181   : > { %v1737_v36 = vpop.eup %1736  ;;  %v729_v2 = vadd.f32 1.0, %v1735_v0 }
 0x182   : > { %v877_v3 = vsel %vm876_vm6, %v1733_v15, %v873_v1  ;;  %v885_v4 = vmul.f32 %v1737_v36, %v728_v45  ;;  %1738 = vpow2.f32 %v1441_v44  ;;  %vm890_vm8 = vweird.f32 %v1737_v36 }
 0x183   : > { %v882_v6 = vsel %vm879_vm7, %v881_v37, %v877_v3  ;;  %1740 = vrcp.f32 %v729_v2  ;;  %vm891_vm10 = vmor %vm889_vm9, %vm890_vm8  ;;  %v908_v30 = vand.u32 2147483647, %v729_v2  ;;  %v910_v31 = vand.u32 2147483648, %v729_v2 }
 0x184   : > { %v983_v7 = vmul.f32 %v882_v6, %v2492_v60  ;;  %v886_v8 = vsub.f32 1.0, %v885_v4  ;;  %v466_v11 = vpop.f32.mrf.mxu0  ;;  %v896_v60 = vor.u32 1.1754944e-38, %v895_v10  ;;  %vm904_vm13 = vweird.f32 %v729_v2  ;;  %v593_v16 = vpop.f32.mrf.mxu2 }
 0x185   : > { %v531_v12 = vpop.f32.mrf.mxu1  ;;  %vm909_vm15 = vcmp.eq.f32.partialorder %v908_v30, 8.507059e+37  ;;  %v658_v45 = vpop.f32.mrf.mxu3 }
 0x186   : > { %v887_v13 = vmul.f32 %v1737_v36, %v886_v8  ;;  %v999_v14 = vmul.f32 %v983_v7, %v650_v5  ;;  %v2512_v18 = vadd.f32 %v531_v12, %v466_v11  ;;  %v659_v3 = vadd.f32 %v658_v45, %v593_v16 }
 0x188   : > { %v1739_v21 = vpop.eup %1738  ;;  %v888_v22 = vadd.f32 %v1737_v36, %v887_v13  ;;  %1017 = vst [vmem:[%s2467_s15 + $0x48] sm:$0xff] %v999_v14  ;;  %v1442_v58 = vmul.f32 -1.442695, %v2512_v18 }
 0x189   : > { %v1741_v59 = vpop.eup %1740  ;;  %v730_v23 = vadd.f32 1.0, %v1739_v21 }
 0x18a   : > { %v892_v24 = vsel %vm891_vm10, %v1737_v36, %v888_v22  ;;  %v900_v25 = vmul.f32 %v1741_v59, %v729_v2  ;;  %1742 = vpow2.f32 %v1442_v58  ;;  %vm905_vm12 = vweird.f32 %v1741_v59 }
 0x18b   : > { %v897_v27 = vsel %vm894_vm11, %v896_v60, %v892_v24  ;;  %1744 = vrcp.f32 %v730_v23  ;;  %vm906_vm14 = vmor %vm904_vm13, %vm905_vm12  ;;  %v923_v52 = vand.u32 2147483647, %v730_v23  ;;  %v925_v53 = vand.u32 2147483648, %v730_v23 }
 0x18c   : > { %v984_v28 = vmul.f32 %v897_v27, %v2497_v17  ;;  %v901_v29 = vsub.f32 1.0, %v900_v25  ;;  %v469_v32 = vpop.f32.mrf.mxu0  ;;  %v911_v17 = vor.u32 1.1754944e-38, %v910_v31  ;;  %vm919_vm1 = vweird.f32 %v730_v23  ;;  %v596_v5 = vpop.f32.mrf.mxu2 }
 0x18d   : > { %v534_v33 = vpop.f32.mrf.mxu1  ;;  %vm924_vm3 = vcmp.eq.f32.partialorder %v923_v52, 8.507059e+37  ;;  %v661_v6 = vpop.f32.mrf.mxu3 }
 0x18e   : > { %v902_v34 = vmul.f32 %v1741_v59, %v901_v29  ;;  %v1000_v35 = vmul.f32 %v984_v28, %v653_v26  ;;  %v2517_v40 = vadd.f32 %v534_v33, %v469_v32 }
 0x190   : > { %v1743_v41 = vpop.eup %1742  ;;  %v903_v42 = vadd.f32 %v1741_v59, %v902_v34  ;;  %1018 = vst [vmem:[%s2467_s15 + $0x50] sm:$0xff] %v1000_v35  ;;  %v1443_v43 = vmul.f32 -1.442695, %v2517_v40 }
 0x191   : > { %v1745_v38 = vpop.eup %1744  ;;  %v731_v15 = vadd.f32 1.0, %v1743_v41 }
 0x192   : > { %v907_v46 = vsel %vm906_vm14, %v1741_v59, %v903_v42  ;;  %v915_v47 = vmul.f32 %v1745_v38, %v730_v23  ;;  %1746 = vpow2.f32 %v1443_v43  ;;  %vm920_vm0 = vweird.f32 %v1745_v38 }
 0x193   : > { %v912_v49 = vsel %vm909_vm15, %v911_v17, %v907_v46  ;;  %1748 = vrcp.f32 %v731_v15  ;;  %vm921_vm2 = vmor %vm919_vm1, %vm920_vm0  ;;  %v940_v9 = vand.u32 2147483648, %v731_v15  ;;  %v938_v11 = vand.u32 2147483647, %v731_v15 }
 0x194   : > { %v985_v50 = vmul.f32 %v912_v49, %v2502_v39  ;;  %v916_v51 = vsub.f32 1.0, %v915_v47  ;;  %v472_v54 = vpop.f32.mrf.mxu0  ;;  %v926_v39 = vor.u32 1.1754944e-38, %v925_v53  ;;  %vm934_vm5 = vweird.f32 %v731_v15  ;;  %v599_v25 = vpop.f32.mrf.mxu2 }
 0x195   : > { %v537_v55 = vpop.f32.mrf.mxu1  ;;  %v941_v20 = vor.u32 1.1754944e-38, %v940_v9  ;;  %vm939_vm7 = vcmp.eq.f32.partialorder %v938_v11, 8.507059e+37  ;;  %v662_v59 = vadd.f32 %v661_v6, %v596_v5  ;;  %v664_v26 = vpop.f32.mrf.mxu3 }
 0x196   : > { %v917_v56 = vmul.f32 %v1745_v38, %v916_v51  ;;  %v1001_v57 = vmul.f32 %v985_v50, %v656_v48  ;;  %v2522_v62 = vadd.f32 %v537_v55, %v472_v54  ;;  %v665_v35 = vadd.f32 %v664_v26, %v599_v25 }
 0x198   : > { %v1747_v63 = vpop.eup %1746  ;;  %v918_v0 = vadd.f32 %v1745_v38, %v917_v56  ;;  %1019 = vst [vmem:[%s2467_s15 + $0x58] sm:$0xff] %v1001_v57  ;;  %v1444_v1 = vmul.f32 -1.442695, %v2522_v62 }
 0x199   : > { %v1749_v44 = vpop.eup %1748  ;;  %v732_v36 = vadd.f32 1.0, %v1747_v63 }
 0x19a   : > { %v922_v37 = vsel %vm921_vm2, %v1745_v38, %v918_v0  ;;  %v930_v2 = vmul.f32 %v1749_v44, %v731_v15  ;;  %1750 = vpow2.f32 %v1444_v1  ;;  %vm935_vm4 = vweird.f32 %v1749_v44 }
 0x19b   : > { %v927_v4 = vsel %vm924_vm3, %v926_v39, %v922_v37  ;;  %1752 = vrcp.f32 %v732_v36  ;;  %vm936_vm6 = vmor %vm934_vm5, %vm935_vm4  ;;  %v955_v24 = vand.u32 2147483648, %v732_v36  ;;  %v953_v28 = vand.u32 2147483647, %v732_v36 }
 0x19c   : > { %v986_v7 = vmul.f32 %v927_v4, %v2507_v61  ;;  %v931_v8 = vsub.f32 1.0, %v930_v2  ;;  %vm949_vm9 = vweird.f32 %v732_v36  ;;  %v602_v16 = vpop.f32.mrf.mxu2 }
 0x19d   : > { %v956_v32 = vor.u32 1.1754944e-38, %v955_v24  ;;  %vm954_vm11 = vcmp.eq.f32.partialorder %v953_v28, 8.507059e+37  ;;  %v667_v45 = vpop.f32.mrf.mxu3 }
 0x19e   : > { %v932_v10 = vmul.f32 %v1749_v44, %v931_v8  ;;  %v1002_v12 = vmul.f32 %v986_v7, %v659_v3  ;;  %v668_v49 = vadd.f32 %v667_v45, %v602_v16 }
 0x1a0   : > { %v1751_v13 = vpop.eup %1750  ;;  %v933_v14 = vadd.f32 %v1749_v44, %v932_v10  ;;  %1020 = vst [vmem:[%s2467_s15 + $0x60] sm:$0xff] %v1002_v12 }
 0x1a1   : > { %v1753_v19 = vpop.eup %1752  ;;  %v733_v21 = vadd.f32 1.0, %v1751_v13 }
 0x1a2   : > { %v937_v22 = vsel %vm936_vm6, %v1749_v44, %v933_v14  ;;  %v945_v58 = vmul.f32 %v1753_v19, %v732_v36  ;;  %vm950_vm8 = vweird.f32 %v1753_v19 }
 0x1a3   : > { %v942_v61 = vsel %vm939_vm7, %v941_v20, %v937_v22  ;;  %1754 = vrcp.f32 %v733_v21  ;;  %vm951_vm10 = vmor %vm949_vm9, %vm950_vm8  ;;  %v970_v43 = vand.u32 2147483648, %v733_v21  ;;  %v968_v17 = vand.u32 2147483647, %v733_v21 }
 0x1a4   : > { %v987_v60 = vmul.f32 %v942_v61, %v2512_v18  ;;  %v946_v23 = vsub.f32 1.0, %v945_v58  ;;  %vm964_vm13 = vweird.f32 %v733_v21 }
 0x1a5   : > { %v971_v47 = vor.u32 1.1754944e-38, %v970_v43  ;;  %vm969_vm15 = vcmp.eq.f32.partialorder %v968_v17, 8.507059e+37 }
 0x1a6   : > { %v947_v27 = vmul.f32 %v1753_v19, %v946_v23  ;;  %v1003_v29 = vmul.f32 %v987_v60, %v662_v59 }
 0x1a8   : > { %v948_v30 = vadd.f32 %v1753_v19, %v947_v27  ;;  %1021 = vst [vmem:[%s2467_s15 + $0x68] sm:$0xff] %v1003_v29 }
 0x1a9   : > { %v1755_v31 = vpop.eup %1754 }
 0x1aa   : > { %v952_v33 = vsel %vm951_vm10, %v1753_v19, %v948_v30  ;;  %v960_v34 = vmul.f32 %v1755_v31, %v733_v21  ;;  %vm965_vm12 = vweird.f32 %v1755_v31 }
 0x1ab   : > { %v957_v18 = vsel %vm954_vm11, %v956_v32, %v952_v33  ;;  %vm966_vm14 = vmor %vm964_vm13, %vm965_vm12 }
 0x1ac   : > { %v988_v41 = vmul.f32 %v957_v18, %v2517_v40  ;;  %v961_v42 = vsub.f32 1.0, %v960_v34 }
 0x1ae   : > { %v962_v38 = vmul.f32 %v1755_v31, %v961_v42  ;;  %v1004_v15 = vmul.f32 %v988_v41, %v665_v35 }
 0x1b0   : > { %v963_v46 = vadd.f32 %v1755_v31, %v962_v38  ;;  %1022 = vst [vmem:[%s2467_s15 + $0x70] sm:$0xff] %v1004_v15 }
 0x1b2   : > { %v967_v48 = vsel %vm966_vm14, %v1755_v31, %v963_v46 }
 0x1b3   : > { %v972_v50 = vsel %vm969_vm15, %v971_v47, %v967_v48 }
 0x1b4   : > { %v989_v40 = vmul.f32 %v972_v50, %v2522_v62 }
 0x1b6   : > { %v1005_v51 = vmul.f32 %v989_v40, %v668_v49 }
 0x1b8   : > { %1023 = vst [vmem:[%s2467_s15 + $0x78] sm:$0xff] %v1005_v51 }
 0x1b9 PF: > { %v1057_v52 = vld [vmem:[%s2347_s6 + $0x78] sm:$0xff]  ;;  %v1056_v53 = vld [vmem:[%s2347_s6 + $0x70] sm:$0xff]  ;;  %v1055_v54 = vld [vmem:[%s2347_s6 + $0x68] sm:$0xff]  ;;  %s2822_s26 = sld [smem:[#allocation22_spill]] }
 0x1ba   : > { %1461 = vmatpush.msra.mxu2 %v1057_v52  ;;  %1462 = vmatpush.msra.mxu3 %v1057_v52  ;;  %v1054_v55 = vld [vmem:[%s2347_s6 + $0x60] sm:$0xff]  ;;  %v1053_v56 = vld [vmem:[%s2347_s6 + $0x58] sm:$0xff]  ;;  %v1052_v57 = vld [vmem:[%s2347_s6 + $0x50] sm:$0xff] }
 0x1bb   : > { %1058 = vmatpush.msra.mxu0 %v1057_v52  ;;  %1460 = vmatpush.msra.mxu1 %v1057_v52  ;;  %v1051_v62 = vld [vmem:[%s2347_s6 + $0x48] sm:$0xff]  ;;  %v1050_v63 = vld [vmem:[%s2347_s6 + $0x40] sm:$0xff]  ;;  %v1049_v0 = vld [vmem:[%s2347_s6 + $0x38] sm:$0xff] }
 0x1bc   : > { %1464 = vmatpush.msra.mxu2 %v1056_v53  ;;  %1465 = vmatpush.msra.mxu3 %v1056_v53  ;;  %v1048_v1 = vld [vmem:[%s2347_s6 + $0x30] sm:$0xff]  ;;  %v1047_v44 = vld [vmem:[%s2347_s6 + $0x28] sm:$0xff]  ;;  %v1046_v39 = vld [vmem:[%s2347_s6 + $0x20] sm:$0xff] }
 0x1bd   : > { %1059 = vmatpush.msra.mxu0 %v1056_v53  ;;  %1463 = vmatpush.msra.mxu1 %v1056_v53  ;;  %v1045_v36 = vld [vmem:[%s2347_s6 + $0x18] sm:$0xff]  ;;  %v1044_v37 = vld [vmem:[%s2347_s6 + $0x10] sm:$0xff]  ;;  %v1043_v2 = vld [vmem:[%s2347_s6 + $0x8] sm:$0xff] }
 0x1be   : > { %1467 = vmatpush.msra.mxu2 %v1055_v54  ;;  %1468 = vmatpush.msra.mxu3 %v1055_v54  ;;  %v1042_v3 = vld [vmem:[%s2347_s6] sm:$0xff] }
 0x1bf   : > { %1060 = vmatpush.msra.mxu0 %v1055_v54  ;;  %1466 = vmatpush.msra.mxu1 %v1055_v54  ;;  %s1446_s12 = sshll.u32 %s2822_s26, 7  ;;  %p1447_p11 = scmp.ne.s32.totalorder %s2822_s26, 0 }
 0x1c0   : > { %1470 = vmatpush.msra.mxu2 %v1054_v55  ;;  %1471 = vmatpush.msra.mxu3 %v1054_v55  ;;  %s2551_s3 = scalar_lea.vmem [#allocation3], %s1446_s12 }
 0x1c1   : > { %1061 = vmatpush.msra.mxu0 %v1054_v55  ;;  %1469 = vmatpush.msra.mxu1 %v1054_v55  ;;  %v1034_v4 = vld [vmem:[%s2551_s3 + $0x40] sm:$0xff]  ;;  %v1035_v8 = vld [vmem:[%s2551_s3 + $0x48] sm:$0xff]  ;;  %v1036_v12 = vld [vmem:[%s2551_s3 + $0x50] sm:$0xff] }
 0x1c2   : > { %1473 = vmatpush.msra.mxu2 %v1053_v56  ;;  %1474 = vmatpush.msra.mxu3 %v1053_v56  ;;  %v1038_v5 = vld [vmem:[%s2551_s3 + $0x60] sm:$0xff]  ;;  %v1039_v9 = vld [vmem:[%s2551_s3 + $0x68] sm:$0xff]  ;;  %v1040_v13 = vld [vmem:[%s2551_s3 + $0x70] sm:$0xff] }
 0x1c3   : > { %1062 = vmatpush.msra.mxu0 %v1053_v56  ;;  %1472 = vmatpush.msra.mxu1 %v1053_v56  ;;  %v1026_v6 = vld [vmem:[%s2551_s3] sm:$0xff]  ;;  %v1027_v10 = vld [vmem:[%s2551_s3 + $0x8] sm:$0xff]  ;;  %v1028_v14 = vld [vmem:[%s2551_s3 + $0x10] sm:$0xff] }
 0x1c4   : > { %1476 = vmatpush.msra.mxu2 %v1052_v57  ;;  %1477 = vmatpush.msra.mxu3 %v1052_v57  ;;  %v1030_v7 = vld [vmem:[%s2551_s3 + $0x20] sm:$0xff]  ;;  %v1031_v11 = vld [vmem:[%s2551_s3 + $0x28] sm:$0xff]  ;;  %v1032_v19 = vld [vmem:[%s2551_s3 + $0x30] sm:$0xff] }
 0x1c5   : > { %1063 = vmatpush.msra.mxu0 %v1052_v57  ;;  %1475 = vmatpush.msra.mxu1 %v1052_v57  ;;  %v1037_v20 = vld [vmem:[%s2551_s3 + $0x58] sm:$0xff] }
 0x1c6   : > { %1479 = vmatpush.msra.mxu2 %v1051_v62  ;;  %1480 = vmatpush.msra.mxu3 %v1051_v62  ;;  %v1041_v21 = vld [vmem:[%s2551_s3 + $0x78] sm:$0xff] }
 0x1c7   : > { %1064 = vmatpush.msra.mxu0 %v1051_v62  ;;  %1478 = vmatpush.msra.mxu1 %v1051_v62  ;;  %v1029_v22 = vld [vmem:[%s2551_s3 + $0x18] sm:$0xff] }
 0x1c8   : > { %1482 = vmatpush.msra.mxu2 %v1050_v63  ;;  %1483 = vmatpush.msra.mxu3 %v1050_v63  ;;  %v1033_v58 = vld [vmem:[%s2551_s3 + $0x38] sm:$0xff] }
 0x1c9   : > { %1065 = vmatpush.msra.mxu0 %v1050_v63  ;;  %1481 = vmatpush.msra.mxu1 %v1050_v63 }
 0x1ca   : > { %1485 = vmatpush.msra.mxu2 %v1049_v0  ;;  %1486 = vmatpush.msra.mxu3 %v1049_v0 }
 0x1cb   : > { %1066 = vmatpush.msra.mxu0 %v1049_v0  ;;  %1484 = vmatpush.msra.mxu1 %v1049_v0 }
 0x1cc   : > { %1488 = vmatpush.msra.mxu2 %v1048_v1  ;;  %1489 = vmatpush.msra.mxu3 %v1048_v1 }
 0x1cd   : > { %1067 = vmatpush.msra.mxu0 %v1048_v1  ;;  %1487 = vmatpush.msra.mxu1 %v1048_v1 }
 0x1ce   : > { %1491 = vmatpush.msra.mxu2 %v1047_v44  ;;  %1492 = vmatpush.msra.mxu3 %v1047_v44 }
 0x1cf   : > { %1068 = vmatpush.msra.mxu0 %v1047_v44  ;;  %1490 = vmatpush.msra.mxu1 %v1047_v44 }
 0x1d0   : > { %1494 = vmatpush.msra.mxu2 %v1046_v39  ;;  %1495 = vmatpush.msra.mxu3 %v1046_v39 }
 0x1d1   : > { %1069 = vmatpush.msra.mxu0 %v1046_v39  ;;  %1493 = vmatpush.msra.mxu1 %v1046_v39 }
 0x1d2   : > { %1497 = vmatpush.msra.mxu2 %v1045_v36  ;;  %1498 = vmatpush.msra.mxu3 %v1045_v36 }
 0x1d3   : > { %1070 = vmatpush.msra.mxu0 %v1045_v36  ;;  %1496 = vmatpush.msra.mxu1 %v1045_v36 }
 0x1d4   : > { %1500 = vmatpush.msra.mxu2 %v1044_v37  ;;  %1501 = vmatpush.msra.mxu3 %v1044_v37 }
 0x1d5   : > { %1071 = vmatpush.msra.mxu0 %v1044_v37  ;;  %1499 = vmatpush.msra.mxu1 %v1044_v37 }
 0x1d6   : > { %1503 = vmatpush.msra.mxu2 %v1043_v2  ;;  %1504 = vmatpush.msra.mxu3 %v1043_v2 }
 0x1d7   : > { %1072 = vmatpush.msra.mxu0 %v1043_v2  ;;  %1502 = vmatpush.msra.mxu1 %v1043_v2 }
 0x1d8   : > { %1506 = vmatpush.msra.mxu2 %v1042_v3  ;;  %1507 = vmatpush.msra.mxu3 %v1042_v3 }
 0x1d9   : > { %1098 = vmatmul.f32.vlgmr.msra.gmra.mxu2 %v1034_v4  ;;  %1110 = vmatmul.f32.vlgmr.msra.gmra.mxu3 %v1038_v5 }
 0x1da   : > { %1073 = vmatpush.msra.mxu0 %v1042_v3  ;;  %1505 = vmatpush.msra.mxu1 %v1042_v3 }
 0x1db   : > { %1074 = vmatmul.f32.vlgmr.msra.gmra.mxu0 %v1026_v6  ;;  %1086 = vmatmul.f32.vlgmr.msra.gmra.mxu1 %v1030_v7 }
 0x1e1   : > { %1101 = vmatmul.f32.gmra.mxu2 %v1035_v8  ;;  %1113 = vmatmul.f32.gmra.mxu3 %v1039_v9 }
 0x1e3   : > { %1077 = vmatmul.f32.gmra.mxu0 %v1027_v10  ;;  %1089 = vmatmul.f32.gmra.mxu1 %v1031_v11 }
 0x1e9   : > { %1104 = vmatmul.f32.gmra.mxu2 %v1036_v12  ;;  %1116 = vmatmul.f32.gmra.mxu3 %v1040_v13 }
 0x1eb   : > { %1080 = vmatmul.f32.gmra.mxu0 %v1028_v14  ;;  %1092 = vmatmul.f32.gmra.mxu1 %v1032_v19 }
 0x1f1   : > { %1107 = vmatmul.f32.gmra.mxu2 %v1037_v20  ;;  %1119 = vmatmul.f32.gmra.mxu3 %v1041_v21 }
 0x1f3   : > { %1083 = vmatmul.f32.gmra.mxu0 %v1029_v22  ;;  %1095 = vmatmul.f32.gmra.mxu1 %v1033_v58 }
 0x258   : > { %v2569_v59 = vpop.f32.mrf.mxu0  ;;  %v2571_v61 = vpop.f32.mrf.mxu1 }
 0x25c   : > { %v2573_v60 = vpop.f32.mrf.mxu2  ;;  %v2575_v23 = vpop.f32.mrf.mxu3 }
 0x260   : > { %v2577_v24 = vpop.f32.mrf.mxu0  ;;  %v2579_v25 = vpop.f32.mrf.mxu1 }
 0x264   : > { %v2581_v26 = vpop.f32.mrf.mxu2  ;;  %v2583_v27 = vpop.f32.mrf.mxu3 }
 0x268   : > { %v2585_v28 = vpop.f32.mrf.mxu0  ;;  %v2587_v29 = vpop.f32.mrf.mxu1 }
 0x26c   : > { %v2589_v30 = vpop.f32.mrf.mxu2  ;;  %v2591_v31 = vpop.f32.mrf.mxu3 }
 0x270   : > { %v2593_v32 = vpop.f32.mrf.mxu0  ;;  %v2595_v33 = vpop.f32.mrf.mxu1  ;;  %1126 = sbr.rel (%p1447_p11) target bundleno = 645 (0x285), region = 52 }
 0x274   : > { %v2597_v34 = vpop.f32.mrf.mxu2  ;;  %v2599_v35 = vpop.f32.mrf.mxu3 }
 0x275   : > { %1127 = vst [vmem:[#allocation2 + $0x30] sm:$0xff] %v2569_v59 }
 0x276   : > { %1128 = vst [vmem:[#allocation2] sm:$0xff] %v2577_v24 }
 0x277   : > { %1129 = vst [vmem:[#allocation2 + $0x58] sm:$0xff] %v2585_v28 }
 0x278   : > { %1130 = vst [vmem:[#allocation2 + $0x18] sm:$0xff] %v2593_v32 }
 0x279   : > { %1131 = vst [vmem:[#allocation2 + $0x50] sm:$0xff] %v2571_v61 }
 0x27a   : > { %1132 = vst [vmem:[#allocation2 + $0x68] sm:$0xff] %v2579_v25 }
 0x27b   : > { %1133 = vst [vmem:[#allocation2 + $0x8] sm:$0xff] %v2587_v29 }
 0x27c   : > { %1134 = vst [vmem:[#allocation2 + $0x48] sm:$0xff] %v2595_v33 }
 0x27d   : > { %1135 = vst [vmem:[#allocation2 + $0x40] sm:$0xff] %v2573_v60 }
 0x27e   : > { %1136 = vst [vmem:[#allocation2 + $0x20] sm:$0xff] %v2581_v26 }
 0x27f   : > { %1137 = vst [vmem:[#allocation2 + $0x10] sm:$0xff] %v2589_v30 }
 0x280   : > { %1138 = vst [vmem:[#allocation2 + $0x38] sm:$0xff] %v2597_v34 }
 0x281   : > { %1139 = vst [vmem:[#allocation2 + $0x60] sm:$0xff] %v2575_v23 }
 0x282   : > { %1140 = vst [vmem:[#allocation2 + $0x70] sm:$0xff] %v2583_v27 }
 0x283   : > { %1141 = vst [vmem:[#allocation2 + $0x78] sm:$0xff] %v2591_v31 }
 0x284   : > { %1142 = vst [vmem:[#allocation2 + $0x28] sm:$0xff] %v2599_v35 }
 0x285 PF: > { %s2823_s2 = sld [smem:[#allocation22_spill]] }
 0x28b   : > { %p1143_p5 = scmp.gt.s32.totalorder %s2823_s2, 0  ;;  %p1144_p4 = scmp.lt.s32.totalorder %s2823_s2, 1 }
 0x28d   : > { %p1145_p0 = pnand %p1144_p4, %p1143_p5 }
 0x28f   : > { %1148 = sbr.rel (%p1145_p0) target bundleno = 679 (0x2a7), region = 56 }
 0x294   : > { %v1149_v18 = vld [vmem:[#allocation2 + $0x30] sm:$0xff]  ;;  %v1150_v41 = vld [vmem:[#allocation2] sm:$0xff]  ;;  %v1151_v42 = vld [vmem:[#allocation2 + $0x58] sm:$0xff] }
 0x295   : > { %v1165_v43 = vadd.f32 %v1149_v18, %v2569_v59  ;;  %v1166_v38 = vadd.f32 %v1150_v41, %v2577_v24  ;;  %v1167_v17 = vadd.f32 %v1151_v42, %v2585_v28  ;;  %v1152_v15 = vld [vmem:[#allocation2 + $0x18] sm:$0xff]  ;;  %v1153_v16 = vld [vmem:[#allocation2 + $0x50] sm:$0xff]  ;;  %v1154_v45 = vld [vmem:[#allocation2 + $0x68] sm:$0xff] }
 0x296   : > { %v1168_v46 = vadd.f32 %v1152_v15, %v2593_v32  ;;  %v1155_v47 = vld [vmem:[#allocation2 + $0x8] sm:$0xff]  ;;  %v1169_v48 = vadd.f32 %v1153_v16, %v2571_v61  ;;  %v1170_v50 = vadd.f32 %v1154_v45, %v2579_v25  ;;  %v1157_v40 = vld [vmem:[#allocation2 + $0x40] sm:$0xff]  ;;  %v1159_v54 = vld [vmem:[#allocation2 + $0x10] sm:$0xff] }
 0x297   : > { %1181 = vst [vmem:[#allocation2 + $0x30] sm:$0xff] %v1165_v43  ;;  %v1156_v49 = vld [vmem:[#allocation2 + $0x48] sm:$0xff]  ;;  %v1171_v51 = vadd.f32 %v1155_v47, %v2587_v29  ;;  %v1158_v52 = vld [vmem:[#allocation2 + $0x20] sm:$0xff]  ;;  %v1173_v55 = vadd.f32 %v1157_v40, %v2573_v60  ;;  %v1160_v56 = vld [vmem:[#allocation2 + $0x38] sm:$0xff]  ;;  %v1175_v63 = vadd.f32 %v1159_v54, %v2589_v30 }
 0x298   : > { %1182 = vst [vmem:[#allocation2] sm:$0xff] %v1166_v38  ;;  %v1172_v53 = vadd.f32 %v1156_v49, %v2595_v33  ;;  %v1174_v57 = vadd.f32 %v1158_v52, %v2581_v26  ;;  %v1161_v62 = vld [vmem:[#allocation2 + $0x60] sm:$0xff]  ;;  %v1162_v0 = vld [vmem:[#allocation2 + $0x70] sm:$0xff]  ;;  %v1176_v1 = vadd.f32 %v1160_v56, %v2597_v34  ;;  %v1163_v44 = vld [vmem:[#allocation2 + $0x78] sm:$0xff] }
 0x299   : > { %1183 = vst [vmem:[#allocation2 + $0x58] sm:$0xff] %v1167_v17  ;;  %v1177_v39 = vadd.f32 %v1161_v62, %v2575_v23  ;;  %v1164_v36 = vld [vmem:[#allocation2 + $0x28] sm:$0xff]  ;;  %v1178_v37 = vadd.f32 %v1162_v0, %v2583_v27  ;;  %v1179_v2 = vadd.f32 %v1163_v44, %v2591_v31 }
 0x29a   : > { %1184 = vst [vmem:[#allocation2 + $0x18] sm:$0xff] %v1168_v46  ;;  %v1180_v3 = vadd.f32 %v1164_v36, %v2599_v35 }
 0x29b   : > { %1185 = vst [vmem:[#allocation2 + $0x50] sm:$0xff] %v1169_v48 }
 0x29c   : > { %1186 = vst [vmem:[#allocation2 + $0x68] sm:$0xff] %v1170_v50 }
 0x29d   : > { %1187 = vst [vmem:[#allocation2 + $0x8] sm:$0xff] %v1171_v51 }
 0x29e   : > { %1188 = vst [vmem:[#allocation2 + $0x48] sm:$0xff] %v1172_v53 }
 0x29f   : > { %1189 = vst [vmem:[#allocation2 + $0x40] sm:$0xff] %v1173_v55 }
 0x2a0   : > { %1190 = vst [vmem:[#allocation2 + $0x20] sm:$0xff] %v1174_v57 }
 0x2a1   : > { %1191 = vst [vmem:[#allocation2 + $0x10] sm:$0xff] %v1175_v63 }
 0x2a2   : > { %1192 = vst [vmem:[#allocation2 + $0x38] sm:$0xff] %v1176_v1 }
 0x2a3   : > { %1193 = vst [vmem:[#allocation2 + $0x60] sm:$0xff] %v1177_v39 }
 0x2a4   : > { %1194 = vst [vmem:[#allocation2 + $0x70] sm:$0xff] %v1178_v37 }
 0x2a5   : > { %1195 = vst [vmem:[#allocation2 + $0x78] sm:$0xff] %v1179_v2 }
 0x2a6   : > { %1196 = vst [vmem:[#allocation2 + $0x28] sm:$0xff] %v1180_v3 }
 0x2a7 PF: > { %s2824_s9 = sld [smem:[#allocation22_spill]] }
 0x2ad   : > { %p1448_p9 = scmp.ne.s32.totalorder %s2824_s9, 1 }
 0x2af   : > { %1200 = sbr.rel (%p1448_p9) target bundleno = 711 (0x2c7), region = 60 }
 0x2b4   : > { %v1201_v4 = vld [vmem:[#allocation2 + $0x30] sm:$0xff]  ;;  %v1202_v5 = vld [vmem:[#allocation2] sm:$0xff]  ;;  %v1203_v6 = vld [vmem:[#allocation2 + $0x58] sm:$0xff] }
 0x2b5   : > { %v1217_v7 = vadd.f32 %v1201_v4, %v2569_v59  ;;  %v1218_v8 = vadd.f32 %v1202_v5, %v2577_v24  ;;  %v1219_v9 = vadd.f32 %v1203_v6, %v2585_v28  ;;  %v1204_v10 = vld [vmem:[#allocation2 + $0x18] sm:$0xff]  ;;  %v1205_v11 = vld [vmem:[#allocation2 + $0x50] sm:$0xff]  ;;  %v1206_v12 = vld [vmem:[#allocation2 + $0x68] sm:$0xff] }
 0x2b6   : > { %v1220_v13 = vadd.f32 %v1204_v10, %v2593_v32  ;;  %v1207_v14 = vld [vmem:[#allocation2 + $0x8] sm:$0xff]  ;;  %v1221_v19 = vadd.f32 %v1205_v11, %v2571_v61  ;;  %v1222_v21 = vadd.f32 %v1206_v12, %v2579_v25  ;;  %v1209_v22 = vld [vmem:[#allocation2 + $0x40] sm:$0xff]  ;;  %v1211_v28 = vld [vmem:[#allocation2 + $0x10] sm:$0xff] }
 0x2b7   : > { %1233 = vst [vmem:[%s2356_s11] sm:$0xff] %v1217_v7  ;;  %v1208_v20 = vld [vmem:[#allocation2 + $0x48] sm:$0xff]  ;;  %v1223_v58 = vadd.f32 %v1207_v14, %v2587_v29  ;;  %v1210_v59 = vld [vmem:[#allocation2 + $0x20] sm:$0xff]  ;;  %v1225_v61 = vadd.f32 %v1209_v22, %v2573_v60  ;;  %v1212_v32 = vld [vmem:[#allocation2 + $0x38] sm:$0xff]  ;;  %v1227_v29 = vadd.f32 %v1211_v28, %v2589_v30 }
 0x2b8   : > { %1234 = vst [vmem:[%s2356_s11 + $0x8] sm:$0xff] %v1218_v8  ;;  %v1224_v24 = vadd.f32 %v1208_v20, %v2595_v33  ;;  %v1226_v25 = vadd.f32 %v1210_v59, %v2581_v26  ;;  %v1213_v18 = vld [vmem:[#allocation2 + $0x60] sm:$0xff]  ;;  %v1214_v41 = vld [vmem:[#allocation2 + $0x70] sm:$0xff]  ;;  %v1228_v33 = vadd.f32 %v1212_v32, %v2597_v34  ;;  %v1215_v42 = vld [vmem:[#allocation2 + $0x78] sm:$0xff] }
 0x2b9   : > { %1235 = vst [vmem:[%s2356_s11 + $0x10] sm:$0xff] %v1219_v9  ;;  %v1229_v60 = vadd.f32 %v1213_v18, %v2575_v23  ;;  %v1216_v43 = vld [vmem:[#allocation2 + $0x28] sm:$0xff]  ;;  %v1230_v26 = vadd.f32 %v1214_v41, %v2583_v27  ;;  %v1231_v38 = vadd.f32 %v1215_v42, %v2591_v31 }
 0x2ba   : > { %1236 = vst [vmem:[%s2356_s11 + $0x18] sm:$0xff] %v1220_v13  ;;  %v1232_v30 = vadd.f32 %v1216_v43, %v2599_v35 }
 0x2bb   : > { %1237 = vst [vmem:[%s2356_s11 + $0x20] sm:$0xff] %v1221_v19 }
 0x2bc   : > { %1238 = vst [vmem:[%s2356_s11 + $0x28] sm:$0xff] %v1222_v21 }
 0x2bd   : > { %1239 = vst [vmem:[%s2356_s11 + $0x30] sm:$0xff] %v1223_v58 }
 0x2be   : > { %1240 = vst [vmem:[%s2356_s11 + $0x38] sm:$0xff] %v1224_v24 }
 0x2bf   : > { %1241 = vst [vmem:[%s2356_s11 + $0x40] sm:$0xff] %v1225_v61 }
 0x2c0   : > { %1242 = vst [vmem:[%s2356_s11 + $0x48] sm:$0xff] %v1226_v25 }
 0x2c1   : > { %1243 = vst [vmem:[%s2356_s11 + $0x50] sm:$0xff] %v1227_v29 }
 0x2c2   : > { %1244 = vst [vmem:[%s2356_s11 + $0x58] sm:$0xff] %v1228_v33 }
 0x2c3   : > { %1245 = vst [vmem:[%s2356_s11 + $0x60] sm:$0xff] %v1229_v60 }
 0x2c4   : > { %1246 = vst [vmem:[%s2356_s11 + $0x68] sm:$0xff] %v1230_v26 }
 0x2c5   : > { %1247 = vst [vmem:[%s2356_s11 + $0x70] sm:$0xff] %v1231_v38 }
 0x2c6   : > { %1248 = vst [vmem:[%s2356_s11 + $0x78] sm:$0xff] %v1232_v30 }
 0x2c7 PF: > { %s2825_s20 = sld [smem:[#allocation24_spill]]  ;;  %s1264_s17 = sshll.u32 %s2356_s11, 4  ;;  %s1265_s17 = int_to_ptr.vmem [resolvable:$true] %s1264_s17 }
 0x2c8   : > { %s2826_s23 = sld [smem:[#allocation23_spill]]  ;;  %s1250_s8 = scalar_lea.sflag [#allocation6], %s301_s4 }
 0x2c9   : > { %s2827_s19 = sld [smem:[#allocation36_spill]] }
 0x2cd   : > { %s1459_s29 = sshll.u32 %s2825_s20, 5 }
 0x2ce   : > { %s1261_s0 = sadd.s32 %s2826_s23, %s1459_s29 }
 0x2cf   : > { %s1452_s5 = sshll.u32 %s1261_s0, 3  ;;  %s2828_s6 = smov %s2827_s19 }
 0x2d0   : > { %s1263_s21 = scalar_lea.hbm %s2827_s19, %s1452_s5  ;;  %s1866_s11 = scalar_lea.hbm %s2828_s6, 512 }
 0x2d1   : > { %s1266_s18 = sshll.u32 %s1263_s21, 4  ;;  %s1267_s18 = int_to_ptr.hbm [resolvable:$true] %s1266_s18 }
 0x2d2   : > { %s1860_s1 = sshra.s32 %s1267_s18, 4  ;;  %s1861_s1 = int_to_ptr.hbm [resolvable:$true] %s1860_s1 }
 0x2d3   : > { %s1862_s15 = scalar_lea.hbm %s1861_s1, 128  ;;  %p1867_p12 = scmp.lt.s32.totalorder %s1861_s1, %s2828_s6 }
 0x2d4   : > { %p1863_p3 = scmp.ne.s32.totalorder %s1861_s1, %s1862_s15  ;;  %p1868_p8 = scmp.lt.s32.totalorder %s1866_s11, %s1862_s15 }
 0x2d6   : > { %p1864_p6 = pnand %p1863_p3, %p2275_p2  ;;  %p1869_p1 = por %p1868_p8, %p1867_p12 }
 0x2d8   : > { %p1865_p7 = pneg %p1864_p6 }
 0x2da   : > { %p1870_p10 = pnand %p1869_p1, %p1865_p7 }
 0x2dc   : > { %1873 = shalt.err (!%p1870_p10)
}
 0x2dd   : > { %s2047_s4 = smov 128   ;;  %s2048_s9 = smov 256  }
 0x2de   : > { %s2049_s20 = smov 8  }
 0x2df   : > { %1514 = dma.vmem_to_hbm [thread:$0]  (%p2275_p2), %s1265_s17, 2048, %s1267_s18, %s1250_s8, %s2047_s4, %s2048_s9, %s2049_s20  }
 0x2e0 PF: > { %s2829_s23 = sld [smem:[#allocation15_spill]]  ;;  %p1531_p11 = scmp.ge.s32.totalorder %s2040_s30, 2 }
 0x2e2   : > { %p1527_p5 = pnand %p1531_p11, %p2279_p13 }
 0x2e4   : > { %p1528_p4 = pneg %p1527_p5 }
 0x2e6   : > { %s1281_s29 = sand.u32 1, %s2829_s23  }
 0x2e7   : > { %s1282_s0 = scalar_lea.sflag [#allocation6], %s1281_s29 }
 0x2e8   : > { %1963 = dma.done.wait (%p1528_p4), %s1282_s0, 2048  }
 0x2e9   : > { %1965 = vsyncadd (%p1528_p4), %s1282_s0, 4294965248  ;;  %s22_s30 = sadd.s32 1, %s2040_s30   ;;  %s2831_s7 = sld [smem:[#allocation32_spill]] }
 0x2ea   : > { %p2692_p0 = scmp.ge.s32.totalorder %s22_s30, 10   ;;  %s2832_s15 = sld [smem:[#allocation17_spill]] }
 0x2eb   : > { %s2833_s16 = sld [smem:[#allocation18_spill]]  ;;  %s2841_s12 = smov %s1972_s13 }
 0x2ec   : > { %s2834_s18 = sld [smem:[#allocation19_spill]]  ;;  %s2843_s13 = smov %s1976_s14 }
 0x2ed   : > { %s2835_s19 = sld [smem:[#allocation20_spill]]  ;;  %s2846_s17 = smov %s2301_s25 }
 0x2ee   : > { %s2836_s20 = sld [smem:[#allocation29_spill]]  ;;  %s2847_s21 = smov %s2008_s22 }
 0x2ef   : > { %s2837_s24 = sld [smem:[#allocation21_spill]]  ;;  %s2845_s14 = smov %s2831_s7 }
 0x2f0   : > { %s2838_s23 = sld [smem:[#allocation31_spill]]  ;;  %s2850_s25 = smov %s2032_s28 }
 0x2f1   : > { %s2839_s26 = sld [smem:[#allocation25_spill]] }
 0x2f2   : > { %s2840_s10 = sld [smem:[#allocation26_spill]] }
 0x2f3   : > { %s2842_s8 = sld [smem:[#allocation27_spill]] }
 0x2f4   : > { %s2844_s29 = sld [smem:[#allocation30_spill]] }
 0x2f5   : > { %s2848_s22 = smov %s2837_s24  ;;  %s2849_s24 = smov %s2028_s27 }
 0x2f6   :  { %21 = sbr.rel (!%p2692_p0) target bundleno = 20 (0x14), region = 119 }
 0x2f8   : > { %s2851_s27 = smov %s2840_s10 }
 0x2f9   : > { %s2852_s28 = smov %s2842_s8 }
 0x2fb   :  { %1288 = vsyncpa [#allocation5], 1 }
 0x2fc   :  { %1290 = vsyncpa [#allocation5 + $0x1], 1 }
 0x2fd   :  { %1291 = vsyncpa [#allocation8], 1 }
 0x2fe   :  { %1293 = vsyncpa [#allocation8 + $0x1], 1 }
 0x2ff   :  { %1294 = vsyncpa [#allocation6], 1 }
 0x300   :  { %1296 = vsyncpa [#allocation6 + $0x1], 1 }

</bundles_post_ra>
